<compile_context>
chip_gen: v7x
topology: tpu7x:2x2x1
jax: 0.10.0
libtpu: 0.0.40
codegen_flags: <defaults>
</compile_context>

<pallas_src>
import functools

import jax
import jax.numpy as jnp
from jax.experimental import pallas as pl
from jax.experimental.pallas import tpu as pltpu


def _pick_tile(total, candidates):
    """Largest candidate tile that divides `total`, else the full extent."""
    for c in candidates:
        if c <= total and total % c == 0:
            return c
    return total


# ----------------------------------------------------------------------------
# Pallas kernels
# ----------------------------------------------------------------------------

def _mm_bias_act_kernel(w_ref, x_ref, b_ref, o_ref, *, act):
    """o = act(w @ x + b); w:(C_out,K) bf16, x:(K,TM) bf16, b:(C_out,1) f32."""
    acc = jnp.dot(w_ref[...], x_ref[...], preferred_element_type=jnp.float32)
    acc = acc + b_ref[...]
    if act == "relu":
        acc = jnp.maximum(acc, 0.0)
    elif act == "tanh":
        acc = jnp.tanh(acc)
    o_ref[...] = acc.astype(o_ref.dtype)


def matmul_bias_act(w2d, x2d, bias, act="none", out_dtype=jnp.float32):
    """Fused act(w2d @ x2d + bias). Output (C_out, M); lane-dense over M."""
    C_out, K = w2d.shape
    K2, M = x2d.shape
    assert K == K2, (K, K2)
    TM = _pick_tile(M, (2048, 1024, 512, 256, 128))
    grid = (M // TM,)

    def nbytes(a):
        return a.size * a.dtype.itemsize

    cost = pl.CostEstimate(
        flops=2 * C_out * K * M,
        transcendentals=0,
        bytes_accessed=nbytes(w2d) + nbytes(x2d) + nbytes(bias)
        + C_out * M * jnp.dtype(out_dtype).itemsize,
    )
    kernel = functools.partial(_mm_bias_act_kernel, act=act)
    return pl.pallas_call(
        kernel,
        out_shape=jax.ShapeDtypeStruct((C_out, M), out_dtype),
        grid=grid,
        in_specs=[
            pl.BlockSpec((C_out, K), lambda i: (0, 0)),   # small weight, resident
            pl.BlockSpec((K, TM), lambda i: (0, i)),      # patches, tiled over M
            pl.BlockSpec((C_out, 1), lambda i: (0, 0)),   # bias
        ],
        out_specs=pl.BlockSpec((C_out, TM), lambda i: (0, i)),
        compiler_params=pltpu.CompilerParams(
            dimension_semantics=("parallel",)),
        cost_estimate=cost,
    )(w2d, x2d, bias)


def _fc_head_kernel(x_ref, w1_ref, b1_ref, w2_ref, b2_ref, o_ref):
    """o = tanh(x @ w1 + b1) @ w2 + b2 (fused FC1 + FC2 head)."""
    h = jnp.dot(x_ref[...], w1_ref[...], preferred_element_type=jnp.float32)
    h = jnp.tanh(h + b1_ref[...])
    o = jnp.dot(h.astype(jnp.bfloat16), w2_ref[...],
                preferred_element_type=jnp.float32)
    o_ref[...] = (o + b2_ref[...]).astype(o_ref.dtype)


def fc_head(flat, w1, b1, w2, b2):
    """Fused tanh(flat @ w1 + b1) @ w2 + b2; flat:(N,2048) bf16."""
    N, H = flat.shape
    H2, D1 = w1.shape
    D1b, D2 = w2.shape
    assert H == H2 and D1 == D1b
    TN = _pick_tile(N, (512, 256, 128, 64, 32, 16, 8))
    grid = (N // TN,)

    def nbytes(a):
        return a.size * a.dtype.itemsize

    cost = pl.CostEstimate(
        flops=2 * N * (H * D1 + D1 * D2),
        transcendentals=N * D1,
        bytes_accessed=nbytes(flat) + nbytes(w1) + nbytes(w2)
        + nbytes(b1) + nbytes(b2) + N * D2 * 4,
    )
    return pl.pallas_call(
        _fc_head_kernel,
        out_shape=jax.ShapeDtypeStruct((N, D2), jnp.float32),
        grid=grid,
        in_specs=[
            pl.BlockSpec((TN, H), lambda i: (i, 0)),
            pl.BlockSpec((H, D1), lambda i: (0, 0)),
            pl.BlockSpec((1, D1), lambda i: (0, 0)),
            pl.BlockSpec((D1, D2), lambda i: (0, 0)),
            pl.BlockSpec((1, D2), lambda i: (0, 0)),
        ],
        out_specs=pl.BlockSpec((TN, D2), lambda i: (i, 0)),
        compiler_params=pltpu.CompilerParams(
            dimension_semantics=("parallel",)),
        cost_estimate=cost,
    )(flat, w1, b1, w2, b2)


# ----------------------------------------------------------------------------
# Glue: channels-major im2col (reshape/slice only, no layout transposes)
# ----------------------------------------------------------------------------

def _im2col_cf(x_cf, k, stride, pad):
    """x_cf: (C, N, H, W) -> patches (C*k*k, N*Ho*Wo), plus (Ho, Wo)."""
    C, N, H, W = x_cf.shape
    xp = jnp.pad(x_cf, ((0, 0), (0, 0), (pad, pad), (pad, pad)))
    Ho = (H + 2 * pad - k) // stride + 1
    Wo = (W + 2 * pad - k) // stride + 1
    taps = []
    for i in range(k):
        for j in range(k):
            taps.append(xp[:, :, i:i + stride * Ho:stride,
                           j:j + stride * Wo:stride])     # (C, N, Ho, Wo)
    cols = jnp.stack(taps, axis=1)                         # (C, k*k, N, Ho, Wo)
    cols = cols.reshape(C * k * k, N * Ho * Wo)            # matches (C_in,kh,kw) flatten
    return cols, Ho, Wo


# ----------------------------------------------------------------------------
# CNN forward
# ----------------------------------------------------------------------------

def init_params(key, in_chann=3, out_classes=10):
    ks = jax.random.split(key, 8)
    # torch-layout parameters (OIHW conv weights, (out,in) linear weights).
    w1 = jax.random.normal(ks[0], (16, in_chann, 5, 5), jnp.float32) * 0.05
    b1 = jax.random.normal(ks[1], (16,), jnp.float32) * 0.05
    w2 = jax.random.normal(ks[2], (32, 16, 3, 3), jnp.float32) * 0.05
    b2 = jax.random.normal(ks[3], (32,), jnp.float32) * 0.05
    wl1 = jax.random.normal(ks[4], (512, 32 * 8 * 8), jnp.float32) * 0.02
    bl1 = jax.random.normal(ks[5], (512,), jnp.float32) * 0.02
    wl2 = jax.random.normal(ks[6], (out_classes, 512), jnp.float32) * 0.02
    bl2 = jax.random.normal(ks[7], (out_classes,), jnp.float32) * 0.02
    # One-time relayout/cast into the kernel-ready format (pre-transposed,
    # bf16 MXU operands) so no per-forward-call weight transposes happen.
    return {
        "w1m": w1.reshape(16, in_chann * 5 * 5).astype(jnp.bfloat16),
        "b1": b1.reshape(16, 1),
        "w2m": w2.reshape(32, 16 * 3 * 3).astype(jnp.bfloat16),
        "b2": b2.reshape(32, 1),
        "wl1": wl1.T.astype(jnp.bfloat16),        # (2048, 512)
        "bl1": bl1.reshape(1, 512),
        "wl2": wl2.T.astype(jnp.bfloat16),        # (512, out_classes)
        "bl2": bl2.reshape(1, out_classes),
    }


def cnn_forward(x, p):
    N = x.shape[0]
    # One-time NCHW -> channels-major (C, N, H, W); all conv stages stay in
    # this layout (lane dim = N*H*W) so no per-stage HBM relayouts.
    x_cf = jnp.transpose(x, (1, 0, 2, 3)).astype(jnp.bfloat16)

    # conv1 + ReLU: (3,N,32,32) -> (16, N*16*16), lane-dense output.
    cols1, Ho1, Wo1 = _im2col_cf(x_cf, k=5, stride=2, pad=2)
    y1 = matmul_bias_act(p["w1m"], cols1, p["b1"], act="relu",
                         out_dtype=jnp.bfloat16)
    y1_cf = y1.reshape(16, N, Ho1, Wo1)

    # conv2 (+ ReLU folded in: relu(maxpool(z)) == maxpool(relu(z))).
    cols2, Ho2, Wo2 = _im2col_cf(y1_cf, k=3, stride=1, pad=1)
    y2 = matmul_bias_act(p["w2m"], cols2, p["b2"], act="relu",
                         out_dtype=jnp.bfloat16)

    # 2x2 max-pool as a reshape-max on the tiny (32, N, 16, 16) tensor, then
    # flatten in torch's NCHW .view(-1, 32*8*8) order.
    Hp, Wp = Ho2 // 2, Wo2 // 2
    pooled = jnp.max(y2.reshape(32, N, Hp, 2, Wp, 2), axis=(3, 5))  # (32,N,8,8)
    flat = jnp.transpose(pooled, (1, 0, 2, 3)).reshape(N, 32 * Hp * Wp)

    # Fused FC1(tanh) + FC2 head -> (N, out_classes) f32.
    return fc_head(flat, p["wl1"], p["bl1"], p["wl2"], p["bl2"])


if __name__ == "__main__":
    key = jax.random.PRNGKey(0)
    k_in, k_p = jax.random.split(key)
    # Module implies 32x32 spatial input (H = 32 * 8 * 8 after the pool).
    x = jax.random.normal(k_in, (2, 3, 32, 32), jnp.float32)
    params = init_params(k_p)

    fwd = jax.jit(cnn_forward)
    out = jax.block_until_ready(fwd(x, params))
    assert out.shape == (2, 10), out.shape
    assert out.dtype == jnp.float32
    print("KERNEL_OK")
</pallas_src>

<mosaic_0001>
module attributes {stable_mosaic.version = 11 : i64} {
  func.func @_mm_bias_act_kernel(%arg0: i32, %arg1: memref<16x75xbf16, #tpu.memory_space<vmem>>, %arg2: memref<75x512xbf16, #tpu.memory_space<vmem>>, %arg3: memref<16x1xf32, #tpu.memory_space<vmem>>, %arg4: memref<16x512xbf16, #tpu.memory_space<vmem>>) attributes {dimension_semantics = [#tpu.dimension_semantics<parallel>], iteration_bounds = array<i64: 1>, scalar_prefetch = 0 : i64, scratch_operands = 0 : i64, tpu.core_type = #tpu.core_type<tc>, window_params = [{pipeline_mode = #tpu.pipeline_mode<synchronous>, transform_indices = @transform_0, window_bounds = array<i64: 16, 75>}, {transform_indices = @transform_1, window_bounds = array<i64: 75, 512>}, {pipeline_mode = #tpu.pipeline_mode<synchronous>, transform_indices = @transform_2, window_bounds = array<i64: 16, 1>}, {transform_indices = @transform_3, window_bounds = array<i64: 16, 512>}]} {
    %c0 = arith.constant 0 : index
    %c0_0 = arith.constant 0 : index
    %0 = vector.load %arg1[%c0, %c0_0] : memref<16x75xbf16, #tpu.memory_space<vmem>>, vector<16x75xbf16>
    %c0_1 = arith.constant 0 : index
    %c0_2 = arith.constant 0 : index
    %1 = vector.load %arg2[%c0_1, %c0_2] : memref<75x512xbf16, #tpu.memory_space<vmem>>, vector<75x512xbf16>
    %cst = arith.constant dense<0.000000e+00> : vector<16x512xf32>
    %2 = tpu.matmul %0, %1, %cst {dimension_numbers = #tpu.dot_dimension_numbers<[1], [0], [0], [1], [0, 0, 1, 1], [], []>} : vector<16x75xbf16>, vector<75x512xbf16>, vector<16x512xf32> -> vector<16x512xf32>
    %c0_3 = arith.constant 0 : index
    %c0_4 = arith.constant 0 : index
    %3 = vector.load %arg3[%c0_3, %c0_4] : memref<16x1xf32, #tpu.memory_space<vmem>>, vector<16x1xf32>
    %4 = vector.broadcast %3 : vector<16x1xf32> to vector<16x512xf32>
    %5 = arith.addf %2, %4 : vector<16x512xf32>
    %cst_5 = arith.constant 0.000000e+00 : f32
    %6 = vector.broadcast %cst_5 : f32 to vector<16x512xf32>
    %7 = arith.maximumf %5, %6 : vector<16x512xf32>
    %8 = arith.truncf %7 : vector<16x512xf32> to vector<16x512xbf16>
    %c0_6 = arith.constant 0 : index
    %c0_7 = arith.constant 0 : index
    %9 = vector.load %arg4[%c0_6, %c0_7] : memref<16x512xbf16, #tpu.memory_space<vmem>>, vector<16x512xbf16>
    tpu.vector_store %arg4[%c0_6, %c0_7], %8 {strides = array<i32>} : memref<16x512xbf16, #tpu.memory_space<vmem>>, vector<16x512xbf16>,
    return
  }
  func.func @transform_0(%arg0: i32) -> (i32, i32) {
    %c0_i32 = arith.constant 0 : i32
    %c0_i32_0 = arith.constant 0 : i32
    %c0_i32_1 = arith.constant 0 : i32
    return %c0_i32, %c0_i32_0 : i32, i32
  }
  func.func @transform_1(%arg0: i32) -> (i32, i32) {
    %c0_i32 = arith.constant 0 : i32
    %c0_i32_0 = arith.constant 0 : i32
    return %c0_i32, %arg0 : i32, i32
  }
  func.func @transform_2(%arg0: i32) -> (i32, i32) {
    %c0_i32 = arith.constant 0 : i32
    %c0_i32_0 = arith.constant 0 : i32
    %c0_i32_1 = arith.constant 0 : i32
    return %c0_i32, %c0_i32_0 : i32, i32
  }
  func.func @transform_3(%arg0: i32) -> (i32, i32) {
    %c0_i32 = arith.constant 0 : i32
    %c0_i32_0 = arith.constant 0 : i32
    return %c0_i32, %arg0 : i32, i32
  }
}

module attributes {stable_mosaic.version = 11 : i64} {
  func.func @_mm_bias_act_kernel(%arg0: i32, %arg1: memref<32x144xbf16, #tpu.memory_space<vmem>>, %arg2: memref<144x512xbf16, #tpu.memory_space<vmem>>, %arg3: memref<32x1xf32, #tpu.memory_space<vmem>>, %arg4: memref<32x512xbf16, #tpu.memory_space<vmem>>) attributes {dimension_semantics = [#tpu.dimension_semantics<parallel>], iteration_bounds = array<i64: 1>, scalar_prefetch = 0 : i64, scratch_operands = 0 : i64, tpu.core_type = #tpu.core_type<tc>, window_params = [{pipeline_mode = #tpu.pipeline_mode<synchronous>, transform_indices = @transform_0, window_bounds = array<i64: 32, 144>}, {transform_indices = @transform_1, window_bounds = array<i64: 144, 512>}, {pipeline_mode = #tpu.pipeline_mode<synchronous>, transform_indices = @transform_2, window_bounds = array<i64: 32, 1>}, {transform_indices = @transform_3, window_bounds = array<i64: 32, 512>}]} {
    %c0 = arith.constant 0 : index
    %c0_0 = arith.constant 0 : index
    %0 = vector.load %arg1[%c0, %c0_0] : memref<32x144xbf16, #tpu.memory_space<vmem>>, vector<32x144xbf16>
    %c0_1 = arith.constant 0 : index
    %c0_2 = arith.constant 0 : index
    %1 = vector.load %arg2[%c0_1, %c0_2] : memref<144x512xbf16, #tpu.memory_space<vmem>>, vector<144x512xbf16>
    %cst = arith.constant dense<0.000000e+00> : vector<32x512xf32>
    %2 = tpu.matmul %0, %1, %cst {dimension_numbers = #tpu.dot_dimension_numbers<[1], [0], [0], [1], [0, 0, 1, 1], [], []>} : vector<32x144xbf16>, vector<144x512xbf16>, vector<32x512xf32> -> vector<32x512xf32>
    %c0_3 = arith.constant 0 : index
    %c0_4 = arith.constant 0 : index
    %3 = vector.load %arg3[%c0_3, %c0_4] : memref<32x1xf32, #tpu.memory_space<vmem>>, vector<32x1xf32>
    %4 = vector.broadcast %3 : vector<32x1xf32> to vector<32x512xf32>
    %5 = arith.addf %2, %4 : vector<32x512xf32>
    %cst_5 = arith.constant 0.000000e+00 : f32
    %6 = vector.broadcast %cst_5 : f32 to vector<32x512xf32>
    %7 = arith.maximumf %5, %6 : vector<32x512xf32>
    %8 = arith.truncf %7 : vector<32x512xf32> to vector<32x512xbf16>
    %c0_6 = arith.constant 0 : index
    %c0_7 = arith.constant 0 : index
    %9 = vector.load %arg4[%c0_6, %c0_7] : memref<32x512xbf16, #tpu.memory_space<vmem>>, vector<32x512xbf16>
    tpu.vector_store %arg4[%c0_6, %c0_7], %8 {strides = array<i32>} : memref<32x512xbf16, #tpu.memory_space<vmem>>, vector<32x512xbf16>,
    return
  }
  func.func @transform_0(%arg0: i32) -> (i32, i32) {
    %c0_i32 = arith.constant 0 : i32
    %c0_i32_0 = arith.constant 0 : i32
    %c0_i32_1 = arith.constant 0 : i32
    return %c0_i32, %c0_i32_0 : i32, i32
  }
  func.func @transform_1(%arg0: i32) -> (i32, i32) {
    %c0_i32 = arith.constant 0 : i32
    %c0_i32_0 = arith.constant 0 : i32
    return %c0_i32, %arg0 : i32, i32
  }
  func.func @transform_2(%arg0: i32) -> (i32, i32) {
    %c0_i32 = arith.constant 0 : i32
    %c0_i32_0 = arith.constant 0 : i32
    %c0_i32_1 = arith.constant 0 : i32
    return %c0_i32, %c0_i32_0 : i32, i32
  }
  func.func @transform_3(%arg0: i32) -> (i32, i32) {
    %c0_i32 = arith.constant 0 : i32
    %c0_i32_0 = arith.constant 0 : i32
    return %c0_i32, %arg0 : i32, i32
  }
}

module attributes {stable_mosaic.version = 11 : i64} {
  func.func @_fc_head_kernel(%arg0: i32, %arg1: memref<2x2048xbf16, #tpu.memory_space<vmem>>, %arg2: memref<2048x512xbf16, #tpu.memory_space<vmem>>, %arg3: memref<1x512xf32, #tpu.memory_space<vmem>>, %arg4: memref<512x10xbf16, #tpu.memory_space<vmem>>, %arg5: memref<1x10xf32, #tpu.memory_space<vmem>>, %arg6: memref<2x10xf32, #tpu.memory_space<vmem>>) attributes {dimension_semantics = [#tpu.dimension_semantics<parallel>], iteration_bounds = array<i64: 1>, scalar_prefetch = 0 : i64, scratch_operands = 0 : i64, tpu.core_type = #tpu.core_type<tc>, window_params = [{transform_indices = @transform_0, window_bounds = array<i64: 2, 2048>}, {pipeline_mode = #tpu.pipeline_mode<synchronous>, transform_indices = @transform_1, window_bounds = array<i64: 2048, 512>}, {pipeline_mode = #tpu.pipeline_mode<synchronous>, transform_indices = @transform_2, window_bounds = array<i64: 1, 512>}, {pipeline_mode = #tpu.pipeline_mode<synchronous>, transform_indices = @transform_3, window_bounds = array<i64: 512, 10>}, {pipeline_mode = #tpu.pipeline_mode<synchronous>, transform_indices = @transform_4, window_bounds = array<i64: 1, 10>}, {transform_indices = @transform_5, window_bounds = array<i64: 2, 10>}]} {
    %c0 = arith.constant 0 : index
    %c0_0 = arith.constant 0 : index
    %0 = vector.load %arg1[%c0, %c0_0] : memref<2x2048xbf16, #tpu.memory_space<vmem>>, vector<2x2048xbf16>
    %c0_1 = arith.constant 0 : index
    %c0_2 = arith.constant 0 : index
    %1 = vector.load %arg2[%c0_1, %c0_2] : memref<2048x512xbf16, #tpu.memory_space<vmem>>, vector<2048x512xbf16>
    %cst = arith.constant dense<0.000000e+00> : vector<2x512xf32>
    %2 = tpu.matmul %0, %1, %cst {dimension_numbers = #tpu.dot_dimension_numbers<[1], [0], [0], [1], [0, 0, 1, 1], [], []>} : vector<2x2048xbf16>, vector<2048x512xbf16>, vector<2x512xf32> -> vector<2x512xf32>
    %c0_3 = arith.constant 0 : index
    %c0_4 = arith.constant 0 : index
    %3 = vector.load %arg3[%c0_3, %c0_4] : memref<1x512xf32, #tpu.memory_space<vmem>>, vector<1x512xf32>
    %4 = vector.broadcast %3 : vector<1x512xf32> to vector<2x512xf32>
    %5 = arith.addf %2, %4 : vector<2x512xf32>
    %6 = math.tanh %5 : vector<2x512xf32>
    %7 = arith.truncf %6 : vector<2x512xf32> to vector<2x512xbf16>
    %c0_5 = arith.constant 0 : index
    %c0_6 = arith.constant 0 : index
    %8 = vector.load %arg4[%c0_5, %c0_6] : memref<512x10xbf16, #tpu.memory_space<vmem>>, vector<512x10xbf16>
    %cst_7 = arith.constant dense<0.000000e+00> : vector<2x10xf32>
    %9 = tpu.matmul %7, %8, %cst_7 {dimension_numbers = #tpu.dot_dimension_numbers<[1], [0], [0], [1], [0, 0, 1, 1], [], []>} : vector<2x512xbf16>, vector<512x10xbf16>, vector<2x10xf32> -> vector<2x10xf32>
    %c0_8 = arith.constant 0 : index
    %c0_9 = arith.constant 0 : index
    %10 = vector.load %arg5[%c0_8, %c0_9] : memref<1x10xf32, #tpu.memory_space<vmem>>, vector<1x10xf32>
    %11 = vector.broadcast %10 : vector<1x10xf32> to vector<2x10xf32>
    %12 = arith.addf %9, %11 : vector<2x10xf32>
    %c0_10 = arith.constant 0 : index
    %c0_11 = arith.constant 0 : index
    %13 = vector.load %arg6[%c0_10, %c0_11] : memref<2x10xf32, #tpu.memory_space<vmem>>, vector<2x10xf32>
    tpu.vector_store %arg6[%c0_10, %c0_11], %12 {strides = array<i32>} : memref<2x10xf32, #tpu.memory_space<vmem>>, vector<2x10xf32>,
    return
  }
  func.func @transform_0(%arg0: i32) -> (i32, i32) {
    %c0_i32 = arith.constant 0 : i32
    %c0_i32_0 = arith.constant 0 : i32
    return %arg0, %c0_i32 : i32, i32
  }
  func.func @transform_1(%arg0: i32) -> (i32, i32) {
    %c0_i32 = arith.constant 0 : i32
    %c0_i32_0 = arith.constant 0 : i32
    %c0_i32_1 = arith.constant 0 : i32
    return %c0_i32, %c0_i32_0 : i32, i32
  }
  func.func @transform_2(%arg0: i32) -> (i32, i32) {
    %c0_i32 = arith.constant 0 : i32
    %c0_i32_0 = arith.constant 0 : i32
    %c0_i32_1 = arith.constant 0 : i32
    return %c0_i32, %c0_i32_0 : i32, i32
  }
  func.func @transform_3(%arg0: i32) -> (i32, i32) {
    %c0_i32 = arith.constant 0 : i32
    %c0_i32_0 = arith.constant 0 : i32
    %c0_i32_1 = arith.constant 0 : i32
    return %c0_i32, %c0_i32_0 : i32, i32
  }
  func.func @transform_4(%arg0: i32) -> (i32, i32) {
    %c0_i32 = arith.constant 0 : i32
    %c0_i32_0 = arith.constant 0 : i32
    %c0_i32_1 = arith.constant 0 : i32
    return %c0_i32, %c0_i32_0 : i32, i32
  }
  func.func @transform_5(%arg0: i32) -> (i32, i32) {
    %c0_i32 = arith.constant 0 : i32
    %c0_i32_0 = arith.constant 0 : i32
    return %arg0, %c0_i32 : i32, i32
  }
}

</mosaic_0001>

<bundles_post_ra>
// kernel: cnn_forward.3
= control target key start
LH: loop header
LB: loop body
LE: loop exit
PB: predicated region body
PF: predicated region fallthrough
CT: control target
= control target key end

     0   :  { %v361_v1 = vmov 0   ;;  %vm154_vm0 = vcmask 1044480   ;;  %vm155_vm1 = vcmask 1045504   ;;  %v362_v10 = vmov 65535   ;;  %s464_s1 = inlined_call_operand.vmem [shape: bf16[75,512], index: 1, kind: input, shape index: {}]   ;;  %s465_s2 = inlined_call_operand.vmem [shape: f32[16,1], index: 2, kind: input, shape index: {}]   ;;  %s466_s0 = inlined_call_operand.vmem [shape: bf16[16,75], index: 0, kind: input, shape index: {}]   ;;  %s467_s3 = inlined_call_operand.vmem [shape: bf16[16,512], index: 3, kind: output, shape index: {}]  }
   0x1   :  { %v330_v0 = vld [vmem:[%s464_s1 + $0x4] ss:$16 sps:$4 sm:$0xff]   ;;  %202 = vmatprep.mubr.bf16.mxu0 %v361_v1  ;;  %245 = vmatprep.mubr.bf16.mxu1 %v361_v1  ;;  %v332_v2 = vld [vmem:[%s464_s1 + $0xc] ss:$16 sps:$4 sm:$0xff]   ;;  %v334_v3 = vld [vmem:[%s464_s1] ss:$16 sps:$4 sm:$0xff]  }
   0x2   :  { %329 = vset.pattern.permute.xlu0 %v361_v1  ;;  %170 = vmatprep.subr.bf16.mxu0 %v330_v0  ;;  %v335_v4 = vld [vmem:[%s464_s1 + $0x8] ss:$16 sps:$4 sm:$0xff]   ;;  %v336_v5 = vld [vmem:[%s464_s1 + $0x24] ss:$16 sps:$4 sm:$0xff]   ;;  %v338_v6 = vld [vmem:[%s464_s1 + $0x2c] ss:$16 sps:$4 sm:$0xff]  }
   0x3   :  { %213 = vmatprep.subr.bf16.mxu1 %v332_v2  ;;  %171 = vmatpush1.bf16.msra.mxu0 %v334_v3  ;;  %v340_v7 = vld [vmem:[%s464_s1 + $0x20] ss:$16 sps:$4 sm:$0xff]   ;;  %v341_v8 = vld [vmem:[%s464_s1 + $0x28] ss:$16 sps:$4 sm:$0xff]   ;;  %v342_v9 = vld [vmem:[%s464_s1 + $0x44] ss:$16 sps:$4 sm:$0xff]  }
   0x4   :  { %214 = vmatpush1.bf16.msra.mxu1 %v335_v4  ;;  %172 = vmatprep.subr.bf16.mxu0 %v336_v5  ;;  %v156_v11 = vsel %vm154_vm0, 4294967295, %v362_v10  ;;  %v344_v12 = vld [vmem:[%s464_s1 + $0x4c] ss:$16 sps:$4 sm:$0xff]   ;;  %v346_v13 = vld [vmem:[%s464_s1 + $0x40] ss:$16 sps:$4 sm:$0xff]   ;;  %vm150_vm2 = vcmask 613376  }
   0x5   :  { %215 = vmatprep.subr.bf16.mxu1 %v338_v6  ;;  %v347_v14 = vld [vmem:[%s464_s1 + $0x48] ss:$16 sps:$4 sm:$0xff]   ;;  %v348_v15 = vld [vmem:[%s464_s1 + $0x64] ss:$16 sps:$4 sm:$0xff]   ;;  %v350_v16 = vld [vmem:[%s464_s1 + $0x6c] ss:$16 sps:$4 sm:$0xff]  }
   0x6   :  { %v352_v17 = vld [vmem:[%s464_s1 + $0x60] ss:$16 sps:$4 sm:$0xff]   ;;  %v353_v18 = vld [vmem:[%s464_s1 + $0x68] ss:$16 sps:$4 sm:$0xff]   ;;  %v157_v19 = vsel %vm155_vm1, %v156_v11, 0 }
   0x7   :  { %173 = vmatpush1.bf16.msra.mxu0 %v340_v7  ;;  %v354_v20 = vld [vmem:[%s464_s1 + $0x84] ss:$16 sps:$4 sm:$0x3f]   ;;  %v356_v21 = vld [vmem:[%s464_s1 + $0x8c] ss:$16 sps:$4 sm:$0x3f]  }
   0x8   :  { %216 = vmatpush1.bf16.msra.mxu1 %v341_v8  ;;  %174 = vmatprep.subr.bf16.mxu0 %v342_v9  ;;  %v162_v22 = vand.u32 %v354_v20, %v157_v19  ;;  %v358_v23 = vld [vmem:[%s464_s1 + $0x80] ss:$16 sps:$4 sm:$0x3f]   ;;  %v359_v24 = vld [vmem:[%s464_s1 + $0x88] ss:$16 sps:$4 sm:$0x3f]   ;;  %v168_v25 = vand.u32 %v356_v21, %v157_v19 }
   0x9   :  { %217 = vmatprep.subr.bf16.mxu1 %v344_v12  ;;  %v37_v26 = vld [vmem:[%s465_s2] sm:$0xff]  ;;  %v159_v27 = vand.u32 %v358_v23, %v157_v19  ;;  %v165_v28 = vand.u32 %v359_v24, %v157_v19  ;;  %v38_v29 = vld [vmem:[%s465_s2 + $0x8] sm:$0xff] }
   0xa   :  { %41 = vperm.xlu0 %329, %v37_v26   ;;  %v360_v30 = vld [vmem:[%s466_s0] sm:$0xff]  }
   0xb   :  { %175 = vmatpush1.bf16.msra.mxu0 %v346_v13 }
   0xc   :  { %218 = vmatpush1.bf16.msra.mxu1 %v347_v14  ;;  %176 = vmatprep.subr.bf16.mxu0 %v348_v15 }
   0xd   :  { %219 = vmatprep.subr.bf16.mxu1 %v350_v16 }
   0xe   :  { %46 = vperm.xlu0 %329, %v38_v29  }
   0xf   :  { %177 = vmatpush1.bf16.msra.mxu0 %v352_v17 }
  0x10   :  { %220 = vmatpush1.bf16.msra.mxu1 %v353_v18  ;;  %178 = vmatprep.subr.bf16.mxu0 %v162_v22 }
  0x11   :  { %221 = vmatprep.subr.bf16.mxu1 %v168_v25 }
  0x13   :  { %179 = vmatpush1.bf16.msra.mxu0 %v159_v27 }
  0x14   :  { %222 = vmatpush1.bf16.msra.mxu1 %v165_v28 }
  0x16   :  { %317 = vmatmul.mubr.msk.bf16.vlgmr.msra.gmra.mrb[0].mxu0 %vm150_vm2, %v360_v30 }
  0x17   :  { %318 = vmatmul.mubr.msk.bf16.vlgmr.msra.gmra.mrb[0].mxu1 %vm150_vm2, %v360_v30 }
  0x89   :  { %v42_v31 = vpop.permute.xlu0 %41 }
  0x8d   :  { %v47_v32 = vpop.permute.xlu0 %46 }
  0xe9   :  { %v204_v33 = vpop.f32.mrb[0].mxu0 }
  0xea   :  { %v247_v34 = vpop.f32.mrb[0].mxu1  ;;  %v205_v35 = vadd.f32 %v204_v33, %v42_v31  ;;  %v206_v37 = vpop.f32.mrb[1].mxu0 }
  0xeb   :  { %v248_v36 = vadd.f32 %v247_v34, %v42_v31  ;;  %v249_v38 = vpop.f32.mrb[1].mxu1  ;;  %v207_v39 = vadd.f32 %v206_v37, %v42_v31  ;;  %v208_v41 = vpop.f32.mrb[2].mxu0 }
  0xec   :  { %v250_v40 = vadd.f32 %v249_v38, %v42_v31  ;;  %v251_v42 = vpop.f32.mrb[2].mxu1  ;;  %v256_v43 = vmax.f32 %v205_v35, 0.0  ;;  %v209_v45 = vadd.f32 %v208_v41, %v47_v32  ;;  %v210_v47 = vpop.f32.mrb[3].mxu0 }
  0xed   :  { %v258_v44 = vmax.f32 %v248_v36, 0.0  ;;  %v252_v46 = vadd.f32 %v251_v42, %v47_v32  ;;  %v253_v48 = vpop.f32.mrb[3].mxu1  ;;  %v257_v49 = vmax.f32 %v207_v39, 0.0  ;;  %v211_v51 = vadd.f32 %v210_v47, %v47_v32 }
  0xee   :  { %v259_v50 = vmax.f32 %v250_v40, 0.0  ;;  %v254_v52 = vadd.f32 %v253_v48, %v47_v32  ;;  %v260_v53 = vmax.f32 %v209_v45, 0.0 }
  0xef   :  { %v262_v54 = vmax.f32 %v252_v46, 0.0  ;;  %v323_v55 = vpack.c.bf16 %v257_v49, %v256_v43  ;;  %v261_v57 = vmax.f32 %v211_v51, 0.0 }
  0xf0   :  { %v324_v56 = vpack.c.bf16 %v259_v50, %v258_v44  ;;  %v263_v58 = vmax.f32 %v254_v52, 0.0 }
  0xf1   :  { %288 = vst [vmem:[%s467_s3] sm:$0xff] %v323_v55  ;;  %v325_v59 = vpack.c.bf16 %v261_v57, %v260_v53 }
  0xf2   :  { %289 = vst [vmem:[%s467_s3 + $0x8] sm:$0xff] %v324_v56  ;;  %v326_v60 = vpack.c.bf16 %v263_v58, %v262_v54 }
  0xf3   :  { %290 = vst [vmem:[%s467_s3 + $0x10] sm:$0xff] %v325_v59 }
  0xf4   :  { %291 = vst [vmem:[%s467_s3 + $0x18] sm:$0xff] %v326_v60 }

// kernel: cnn_forward.4
= control target key start
LH: loop header
LB: loop body
LE: loop exit
PB: predicated region body
PF: predicated region fallthrough
CT: control target
= control target key end

     0   :  { %v589_v1 = vmov 0   ;;  %vm277_vm0 = vcmask 130048   ;;  %s770_s1 = inlined_call_operand.vmem [shape: bf16[144,512], index: 1, kind: input, shape index: {}]   ;;  %s771_s0 = inlined_call_operand.vmem [shape: bf16[32,144], index: 0, kind: input, shape index: {}]   ;;  %s772_s2 = inlined_call_operand.vmem [shape: f32[32,1], index: 2, kind: input, shape index: {}]   ;;  %s773_s3 = inlined_call_operand.vmem [shape: bf16[32,512], index: 3, kind: output, shape index: {}]  }
   0x1   :  { %v529_v0 = vld [vmem:[%s770_s1 + $0x4] ss:$16 sps:$4 sm:$0xff]   ;;  %527 = vset.pattern.permute.xlu0 %v589_v1  ;;  %528 = vset.pattern.permute.xlu1 %v589_v1  ;;  %v531_v2 = vld [vmem:[%s770_s1 + $0xc] ss:$16 sps:$4 sm:$0xff]   ;;  %v533_v3 = vld [vmem:[%s770_s1] ss:$16 sps:$4 sm:$0xff]  }
   0x2   :  { %284 = vmatprep.subr.bf16.mxu0 %v529_v0  ;;  %v534_v4 = vld [vmem:[%s770_s1 + $0x8] ss:$16 sps:$4 sm:$0xff]   ;;  %337 = vmatprep.subr.bf16.mxu1 %v531_v2  ;;  %v535_v5 = vld [vmem:[%s770_s1 + $0x24] ss:$16 sps:$4 sm:$0xff]   ;;  %v537_v6 = vld [vmem:[%s770_s1 + $0x2c] ss:$16 sps:$4 sm:$0xff]  }
   0x3   :  { %285 = vmatpush1.bf16.msra.mxu0 %v533_v3  ;;  %338 = vmatpush1.bf16.msra.mxu1 %v534_v4  ;;  %v539_v7 = vld [vmem:[%s770_s1 + $0x20] ss:$16 sps:$4 sm:$0xff]   ;;  %v540_v8 = vld [vmem:[%s770_s1 + $0x28] ss:$16 sps:$4 sm:$0xff]   ;;  %v541_v9 = vld [vmem:[%s770_s1 + $0x44] ss:$16 sps:$4 sm:$0xff]  }
   0x4   :  { %286 = vmatprep.subr.bf16.mxu0 %v535_v5  ;;  %339 = vmatprep.subr.bf16.mxu1 %v537_v6  ;;  %v543_v10 = vld [vmem:[%s770_s1 + $0x4c] ss:$16 sps:$4 sm:$0xff]   ;;  %v545_v11 = vld [vmem:[%s770_s1 + $0x40] ss:$16 sps:$4 sm:$0xff]   ;;  %v546_v12 = vld [vmem:[%s770_s1 + $0x48] ss:$16 sps:$4 sm:$0xff]  }
   0x5   :  { %v547_v13 = vld [vmem:[%s770_s1 + $0x64] ss:$16 sps:$4 sm:$0xff]   ;;  %v549_v14 = vld [vmem:[%s770_s1 + $0x6c] ss:$16 sps:$4 sm:$0xff]   ;;  %v551_v15 = vld [vmem:[%s770_s1 + $0x60] ss:$16 sps:$4 sm:$0xff]  }
   0x6   :  { %v552_v16 = vld [vmem:[%s770_s1 + $0x68] ss:$16 sps:$4 sm:$0xff]   ;;  %v553_v17 = vld [vmem:[%s770_s1 + $0x84] ss:$16 sps:$4 sm:$0xff]   ;;  %v555_v18 = vld [vmem:[%s770_s1 + $0x8c] ss:$16 sps:$4 sm:$0xff]  }
   0x7   :  { %287 = vmatpush1.bf16.msra.mxu0 %v539_v7  ;;  %340 = vmatpush1.bf16.msra.mxu1 %v540_v8  ;;  %v557_v19 = vld [vmem:[%s770_s1 + $0x80] ss:$16 sps:$4 sm:$0xff]   ;;  %v558_v20 = vld [vmem:[%s770_s1 + $0x88] ss:$16 sps:$4 sm:$0xff]   ;;  %v559_v21 = vld [vmem:[%s770_s1 + $0xa4] ss:$16 sps:$4 sm:$0xff]  }
   0x8   :  { %288 = vmatprep.subr.bf16.mxu0 %v541_v9  ;;  %341 = vmatprep.subr.bf16.mxu1 %v543_v10  ;;  %v561_v22 = vld [vmem:[%s770_s1 + $0xac] ss:$16 sps:$4 sm:$0xff]   ;;  %v563_v23 = vld [vmem:[%s770_s1 + $0xa0] ss:$16 sps:$4 sm:$0xff]   ;;  %v564_v24 = vld [vmem:[%s770_s1 + $0xa8] ss:$16 sps:$4 sm:$0xff]  }
   0x9   :  { %v565_v25 = vld [vmem:[%s770_s1 + $0xc4] ss:$16 sps:$4 sm:$0xff]   ;;  %v567_v26 = vld [vmem:[%s770_s1 + $0xcc] ss:$16 sps:$4 sm:$0xff]   ;;  %v569_v27 = vld [vmem:[%s770_s1 + $0xc0] ss:$16 sps:$4 sm:$0xff]  }
   0xa   :  { %v570_v28 = vld [vmem:[%s770_s1 + $0xc8] ss:$16 sps:$4 sm:$0xff]   ;;  %v571_v29 = vld [vmem:[%s770_s1 + $0xe4] ss:$16 sps:$4 sm:$0xff]   ;;  %v573_v30 = vld [vmem:[%s770_s1 + $0xec] ss:$16 sps:$4 sm:$0xff]  }
   0xb   :  { %289 = vmatpush1.bf16.msra.mxu0 %v545_v11  ;;  %342 = vmatpush1.bf16.msra.mxu1 %v546_v12  ;;  %v585_v31 = vld [vmem:[%s771_s0 + $0x4] ss:$8 sps:$4 sm:$0xff]   ;;  %v57_v33 = vld [vmem:[%s772_s2 + $0x10] sm:$0xff]  ;;  %v576_v35 = vld [vmem:[%s770_s1 + $0xe8] ss:$16 sps:$4 sm:$0xff]  }
   0xc   :  { %290 = vmatprep.subr.bf16.mxu0 %v547_v13  ;;  %343 = vmatprep.subr.bf16.mxu1 %v549_v14  ;;  %v55_v32 = vld [vmem:[%s772_s2] sm:$0xff]  ;;  %v579_v37 = vld [vmem:[%s770_s1 + $0x10c] ss:$16 sps:$4 sm:$0xff]   ;;  %v582_v41 = vld [vmem:[%s770_s1 + $0x108] ss:$16 sps:$4 sm:$0xff]  }
   0xd   :  { %506 = vmatprep.mubr.msk.bf16.mxu0 %vm277_vm0, %v585_v31  ;;  %508 = vmatprep.mubr.msk.bf16.mxu1 %vm277_vm0, %v585_v31  ;;  %v575_v34 = vld [vmem:[%s770_s1 + $0xe0] ss:$16 sps:$4 sm:$0xff]   ;;  %v577_v36 = vld [vmem:[%s770_s1 + $0x104] ss:$16 sps:$4 sm:$0xff]   ;;  %v56_v38 = vld [vmem:[%s772_s2 + $0x8] sm:$0xff] }
   0xe   :  { %61 = vperm.xlu0 %527, %v55_v32   ;;  %71 = vperm.xlu1 %528, %v57_v33   ;;  %v58_v39 = vld [vmem:[%s772_s2 + $0x18] sm:$0xff]  ;;  %v581_v40 = vld [vmem:[%s770_s1 + $0x100] ss:$16 sps:$4 sm:$0xff]  }
   0xf   :  { %291 = vmatpush1.bf16.msra.mxu0 %v551_v15  ;;  %344 = vmatpush1.bf16.msra.mxu1 %v552_v16  ;;  %v583_v42 = vld [vmem:[%s771_s0] ss:$8 sps:$4 sm:$0xff]   ;;  %v586_v43 = vld [vmem:[%s771_s0 + $0x14] ss:$8 sps:$4 sm:$0xff]   ;;  %v588_v44 = vld [vmem:[%s771_s0 + $0x10] ss:$8 sps:$4 sm:$0xff]  }
  0x10   :  { %292 = vmatprep.subr.bf16.mxu0 %v553_v17  ;;  %345 = vmatprep.subr.bf16.mxu1 %v555_v18 }
  0x12   :  { %66 = vperm.xlu0 %527, %v56_v38   ;;  %76 = vperm.xlu1 %528, %v58_v39  }
  0x13   :  { %293 = vmatpush1.bf16.msra.mxu0 %v557_v19  ;;  %346 = vmatpush1.bf16.msra.mxu1 %v558_v20 }
  0x14   :  { %294 = vmatprep.subr.bf16.mxu0 %v559_v21  ;;  %347 = vmatprep.subr.bf16.mxu1 %v561_v22 }
  0x17   :  { %295 = vmatpush1.bf16.msra.mxu0 %v563_v23  ;;  %348 = vmatpush1.bf16.msra.mxu1 %v564_v24 }
  0x18   :  { %296 = vmatprep.subr.bf16.mxu0 %v565_v25  ;;  %349 = vmatprep.subr.bf16.mxu1 %v567_v26 }
  0x1b   :  { %297 = vmatpush1.bf16.msra.mxu0 %v569_v27  ;;  %350 = vmatpush1.bf16.msra.mxu1 %v570_v28 }
  0x1c   :  { %298 = vmatprep.subr.bf16.mxu0 %v571_v29  ;;  %351 = vmatprep.subr.bf16.mxu1 %v573_v30 }
  0x1f   :  { %299 = vmatpush1.bf16.msra.mxu0 %v575_v34  ;;  %352 = vmatpush1.bf16.msra.mxu1 %v576_v35 }
  0x20   :  { %300 = vmatprep.subr.bf16.mxu0 %v577_v36  ;;  %353 = vmatprep.subr.bf16.mxu1 %v579_v37 }
  0x23   :  { %301 = vmatpush1.bf16.msra.mxu0 %v581_v40  ;;  %354 = vmatpush1.bf16.msra.mxu1 %v582_v41 }
  0x26   :  { %317 = vmatmul.mubr.bf16.vlgmr.msra.gmra.mrb[0].mxu0 %v583_v42  ;;  %370 = vmatmul.mubr.bf16.vlgmr.msra.gmra.mrb[0].mxu1 %v583_v42 }
  0x27   :  { %507 = vmatprep.mubr.msk.bf16.mxu0 %vm277_vm0, %v586_v43  ;;  %509 = vmatprep.mubr.msk.bf16.mxu1 %vm277_vm0, %v586_v43 }
  0x2e   :  { %327 = vmatmul.mubr.bf16.gmra.mrb[4].mxu0 %v588_v44  ;;  %380 = vmatmul.mubr.bf16.gmra.mrb[4].mxu1 %v588_v44 }
  0x8d   :  { %v62_v45 = vpop.permute.xlu0 %61  ;;  %v72_v47 = vpop.permute.xlu1 %71 }
  0x91   :  { %v67_v46 = vpop.permute.xlu0 %66  ;;  %v77_v10 = vpop.permute.xlu1 %76 }
  0xf9   :  { %v318_v48 = vpop.f32.mrb[0].mxu0  ;;  %v371_v49 = vpop.f32.mrb[0].mxu1 }
  0xfa   :  { %v319_v50 = vadd.f32 %v318_v48, %v62_v45  ;;  %v372_v51 = vadd.f32 %v371_v49, %v62_v45  ;;  %v320_v52 = vpop.f32.mrb[1].mxu0  ;;  %v373_v53 = vpop.f32.mrb[1].mxu1 }
  0xfb   :  { %v321_v54 = vadd.f32 %v320_v52, %v62_v45  ;;  %v374_v55 = vadd.f32 %v373_v53, %v62_v45  ;;  %v322_v56 = vpop.f32.mrb[2].mxu0  ;;  %v375_v57 = vpop.f32.mrb[2].mxu1 }
  0xfc   :  { %v390_v58 = vmax.f32 %v319_v50, 0.0  ;;  %v392_v59 = vmax.f32 %v372_v51, 0.0  ;;  %v323_v60 = vadd.f32 %v322_v56, %v67_v46  ;;  %v376_v61 = vadd.f32 %v375_v57, %v67_v46  ;;  %v324_v62 = vpop.f32.mrb[3].mxu0  ;;  %v377_v63 = vpop.f32.mrb[3].mxu1 }
  0xfd   :  { %v391_v0 = vmax.f32 %v321_v54, 0.0  ;;  %v393_v1 = vmax.f32 %v374_v55, 0.0  ;;  %v325_v2 = vadd.f32 %v324_v62, %v67_v46  ;;  %v378_v3 = vadd.f32 %v377_v63, %v67_v46 }
  0xfe   :  { %v394_v4 = vmax.f32 %v323_v60, 0.0  ;;  %v396_v5 = vmax.f32 %v376_v61, 0.0 }
  0xff   :  { %v518_v6 = vpack.c.bf16 %v391_v0, %v390_v58  ;;  %v519_v7 = vpack.c.bf16 %v393_v1, %v392_v59  ;;  %v395_v8 = vmax.f32 %v325_v2, 0.0  ;;  %v397_v9 = vmax.f32 %v378_v3, 0.0 }
 0x101   :  { %454 = vst [vmem:[%s773_s3] sm:$0xff] %v518_v6  ;;  %455 = vst [vmem:[%s773_s3 + $0x8] sm:$0xff] %v519_v7  ;;  %v520_v11 = vpack.c.bf16 %v395_v8, %v394_v4  ;;  %v521_v12 = vpack.c.bf16 %v397_v9, %v396_v5  ;;  %v328_v13 = vpop.f32.mrb[4].mxu0  ;;  %v381_v14 = vpop.f32.mrb[4].mxu1 }
 0x102   :  { %v329_v15 = vadd.f32 %v328_v13, %v72_v47  ;;  %v382_v16 = vadd.f32 %v381_v14, %v72_v47  ;;  %v330_v17 = vpop.f32.mrb[5].mxu0  ;;  %v383_v18 = vpop.f32.mrb[5].mxu1 }
 0x103   :  { %456 = vst [vmem:[%s773_s3 + $0x10] sm:$0xff] %v520_v11  ;;  %457 = vst [vmem:[%s773_s3 + $0x18] sm:$0xff] %v521_v12  ;;  %v331_v19 = vadd.f32 %v330_v17, %v72_v47  ;;  %v384_v20 = vadd.f32 %v383_v18, %v72_v47  ;;  %v332_v21 = vpop.f32.mrb[6].mxu0  ;;  %v385_v22 = vpop.f32.mrb[6].mxu1 }
 0x104   :  { %v398_v23 = vmax.f32 %v329_v15, 0.0  ;;  %v400_v24 = vmax.f32 %v382_v16, 0.0  ;;  %v333_v25 = vadd.f32 %v332_v21, %v77_v10  ;;  %v386_v26 = vadd.f32 %v385_v22, %v77_v10  ;;  %v334_v27 = vpop.f32.mrb[7].mxu0  ;;  %v387_v28 = vpop.f32.mrb[7].mxu1 }
 0x105   :  { %v399_v29 = vmax.f32 %v331_v19, 0.0  ;;  %v401_v30 = vmax.f32 %v384_v20, 0.0  ;;  %v335_v31 = vadd.f32 %v334_v27, %v77_v10  ;;  %v388_v32 = vadd.f32 %v387_v28, %v77_v10 }
 0x106   :  { %v402_v33 = vmax.f32 %v333_v25, 0.0  ;;  %v404_v34 = vmax.f32 %v386_v26, 0.0 }
 0x107   :  { %v522_v35 = vpack.c.bf16 %v399_v29, %v398_v23  ;;  %v523_v36 = vpack.c.bf16 %v401_v30, %v400_v24  ;;  %v403_v37 = vmax.f32 %v335_v31, 0.0  ;;  %v405_v38 = vmax.f32 %v388_v32, 0.0 }
 0x109   :  { %458 = vst [vmem:[%s773_s3 + $0x20] sm:$0xff] %v522_v35  ;;  %459 = vst [vmem:[%s773_s3 + $0x28] sm:$0xff] %v523_v36  ;;  %v524_v39 = vpack.c.bf16 %v403_v37, %v402_v33  ;;  %v525_v40 = vpack.c.bf16 %v405_v38, %v404_v34 }
 0x10b   :  { %460 = vst [vmem:[%s773_s3 + $0x30] sm:$0xff] %v524_v39  ;;  %461 = vst [vmem:[%s773_s3 + $0x38] sm:$0xff] %v525_v40 }

// kernel: cnn_forward.5
= control target key start
LH: loop header
LB: loop body
LE: loop exit
PB: predicated region body
PF: predicated region fallthrough
CT: control target
= control target key end

     0   :  { %v538_v36 = vlaneseq  ;;  %v5742_v37 = vmov 1966171168   ;;  %s7518_s0 = inlined_call_operand.vmem [shape: bf16[2,2048], index: 0, kind: input, shape index: {}]   ;;  %s7519_s1 = inlined_call_operand.vmem [shape: bf16[2048,512], index: 1, kind: input, shape index: {}]   ;;  %s7520_s2 = inlined_call_operand.vmem [shape: f32[1,512], index: 2, kind: input, shape index: {}]   ;;  %s7521_s3 = inlined_call_operand.vmem [shape: bf16[512,10], index: 3, kind: input, shape index: {}]   ;;  %s7522_s4 = inlined_call_operand.vmem [shape: f32[1,10], index: 4, kind: input, shape index: {}]   ;;  %s7523_s5 = inlined_call_operand.hbm [shape: f32[2,10], index: 5, kind: output, shape index: {}]  }
   0x1   :  { %v4908_v0 = vld [vmem:[%s7519_s1 + $0x4] ss:$16 sps:$4 sm:$0xff]   ;;  %v4910_v1 = vld [vmem:[%s7519_s1 + $0xc] ss:$16 sps:$4 sm:$0xff]   ;;  %v4912_v2 = vld [vmem:[%s7519_s1] ss:$16 sps:$4 sm:$0xff]   ;;  %v562_v38 = vunpack.c.l.s4 %v5742_v37 }
   0x2   :  { %3234 = vmatprep.subr.bf16.mxu0 %v4908_v0  ;;  %v4913_v3 = vld [vmem:[%s7519_s1 + $0x8] ss:$16 sps:$4 sm:$0xff]   ;;  %3562 = vmatprep.subr.bf16.mxu1 %v4910_v1  ;;  %v4914_v4 = vld [vmem:[%s7519_s1 + $0x24] ss:$16 sps:$4 sm:$0xff]   ;;  %v4916_v5 = vld [vmem:[%s7519_s1 + $0x2c] ss:$16 sps:$4 sm:$0xff]  }
   0x3   :  { %3235 = vmatpush1.bf16.msra.mxu0 %v4912_v2  ;;  %3563 = vmatpush1.bf16.msra.mxu1 %v4913_v3  ;;  %v4918_v6 = vld [vmem:[%s7519_s1 + $0x20] ss:$16 sps:$4 sm:$0xff]   ;;  %v4919_v7 = vld [vmem:[%s7519_s1 + $0x28] ss:$16 sps:$4 sm:$0xff]   ;;  %v4920_v8 = vld [vmem:[%s7519_s1 + $0x44] ss:$16 sps:$4 sm:$0xff]   ;;  %v563_v43 = vunpack.c.0.s8 %v562_v38 }
   0x4   :  { %3236 = vmatprep.subr.bf16.mxu0 %v4914_v4  ;;  %3564 = vmatprep.subr.bf16.mxu1 %v4916_v5  ;;  %v4922_v9 = vld [vmem:[%s7519_s1 + $0x4c] ss:$16 sps:$4 sm:$0xff]   ;;  %v4924_v10 = vld [vmem:[%s7519_s1 + $0x40] ss:$16 sps:$4 sm:$0xff]   ;;  %v4925_v11 = vld [vmem:[%s7519_s1 + $0x48] ss:$16 sps:$4 sm:$0xff]  }
   0x5   :  { %v4926_v12 = vld [vmem:[%s7519_s1 + $0x64] ss:$16 sps:$4 sm:$0xff]   ;;  %v4928_v13 = vld [vmem:[%s7519_s1 + $0x6c] ss:$16 sps:$4 sm:$0xff]   ;;  %v4930_v14 = vld [vmem:[%s7519_s1 + $0x60] ss:$16 sps:$4 sm:$0xff]  }
   0x6   :  { %v4931_v15 = vld [vmem:[%s7519_s1 + $0x68] ss:$16 sps:$4 sm:$0xff]   ;;  %v4932_v16 = vld [vmem:[%s7519_s1 + $0x84] ss:$16 sps:$4 sm:$0xff]   ;;  %v4934_v17 = vld [vmem:[%s7519_s1 + $0x8c] ss:$16 sps:$4 sm:$0xff]  }
   0x7   :  { %3237 = vmatpush1.bf16.msra.mxu0 %v4918_v6  ;;  %3565 = vmatpush1.bf16.msra.mxu1 %v4919_v7  ;;  %v4936_v18 = vld [vmem:[%s7519_s1 + $0x80] ss:$16 sps:$4 sm:$0xff]   ;;  %v4937_v19 = vld [vmem:[%s7519_s1 + $0x88] ss:$16 sps:$4 sm:$0xff]   ;;  %v4938_v20 = vld [vmem:[%s7519_s1 + $0xa4] ss:$16 sps:$4 sm:$0xff]  }
   0x8   :  { %3238 = vmatprep.subr.bf16.mxu0 %v4920_v8  ;;  %3566 = vmatprep.subr.bf16.mxu1 %v4922_v9  ;;  %v4940_v21 = vld [vmem:[%s7519_s1 + $0xac] ss:$16 sps:$4 sm:$0xff]   ;;  %v4942_v22 = vld [vmem:[%s7519_s1 + $0xa0] ss:$16 sps:$4 sm:$0xff]   ;;  %v4943_v23 = vld [vmem:[%s7519_s1 + $0xa8] ss:$16 sps:$4 sm:$0xff]  }
   0x9   :  { %v4944_v24 = vld [vmem:[%s7519_s1 + $0xc4] ss:$16 sps:$4 sm:$0xff]   ;;  %v4946_v25 = vld [vmem:[%s7519_s1 + $0xcc] ss:$16 sps:$4 sm:$0xff]   ;;  %v4948_v26 = vld [vmem:[%s7519_s1 + $0xc0] ss:$16 sps:$4 sm:$0xff]  }
   0xa   :  { %v4949_v27 = vld [vmem:[%s7519_s1 + $0xc8] ss:$16 sps:$4 sm:$0xff]   ;;  %v4950_v28 = vld [vmem:[%s7519_s1 + $0xe4] ss:$16 sps:$4 sm:$0xff]   ;;  %v4952_v29 = vld [vmem:[%s7519_s1 + $0xec] ss:$16 sps:$4 sm:$0xff]  }
   0xb   :  { %3239 = vmatpush1.bf16.msra.mxu0 %v4924_v10  ;;  %3567 = vmatpush1.bf16.msra.mxu1 %v4925_v11  ;;  %v4954_v30 = vld [vmem:[%s7519_s1 + $0xe0] ss:$16 sps:$4 sm:$0xff]   ;;  %v4955_v31 = vld [vmem:[%s7519_s1 + $0xe8] ss:$16 sps:$4 sm:$0xff]   ;;  %v4956_v32 = vld [vmem:[%s7519_s1 + $0x104] ss:$16 sps:$4 sm:$0xff]  }
   0xc   :  { %3240 = vmatprep.subr.bf16.mxu0 %v4926_v12  ;;  %3568 = vmatprep.subr.bf16.mxu1 %v4928_v13  ;;  %v4958_v33 = vld [vmem:[%s7519_s1 + $0x10c] ss:$16 sps:$4 sm:$0xff]   ;;  %v4960_v34 = vld [vmem:[%s7519_s1 + $0x100] ss:$16 sps:$4 sm:$0xff]   ;;  %v4961_v35 = vld [vmem:[%s7519_s1 + $0x108] ss:$16 sps:$4 sm:$0xff]  }
   0xd   :  { %v4962_v39 = vld [vmem:[%s7519_s1 + $0x124] ss:$16 sps:$4 sm:$0xff]   ;;  %v4964_v40 = vld [vmem:[%s7519_s1 + $0x12c] ss:$16 sps:$4 sm:$0xff]   ;;  %v4966_v41 = vld [vmem:[%s7519_s1 + $0x120] ss:$16 sps:$4 sm:$0xff]  }
   0xe   :  { %v5891_v42 = vshrl.u32 %v538_v36, 7  ;;  %v4967_v44 = vld [vmem:[%s7519_s1 + $0x128] ss:$16 sps:$4 sm:$0xff]   ;;  %v4968_v45 = vld [vmem:[%s7519_s1 + $0x144] ss:$16 sps:$4 sm:$0xff]  }
   0xf   :  { %3241 = vmatpush1.bf16.msra.mxu0 %v4930_v14  ;;  %3569 = vmatpush1.bf16.msra.mxu1 %v4931_v15  ;;  %v4970_v46 = vld [vmem:[%s7519_s1 + $0x14c] ss:$16 sps:$4 sm:$0xff]   ;;  %v4972_v47 = vld [vmem:[%s7519_s1 + $0x140] ss:$16 sps:$4 sm:$0xff]   ;;  %v4973_v48 = vld [vmem:[%s7519_s1 + $0x148] ss:$16 sps:$4 sm:$0xff]  }
  0x10   :  { %3242 = vmatprep.subr.bf16.mxu0 %v4932_v16  ;;  %3570 = vmatprep.subr.bf16.mxu1 %v4934_v17  ;;  %v5909_v49 = vsub.s32 %v563_v43, %v5891_v42  ;;  %v4974_v50 = vld [vmem:[%s7519_s1 + $0x164] ss:$16 sps:$4 sm:$0xff]   ;;  %v4976_v51 = vld [vmem:[%s7519_s1 + $0x16c] ss:$16 sps:$4 sm:$0xff]   ;;  %v4978_v53 = vld [vmem:[%s7519_s1 + $0x160] ss:$16 sps:$4 sm:$0xff]  }
  0x11   :  { %v5920_v52 = vld [vmem:[%s7518_s0] sm:$0xff]  ;;  %v4979_v55 = vld [vmem:[%s7519_s1 + $0x168] ss:$16 sps:$4 sm:$0xff]   ;;  %v4982_v57 = vld [vmem:[%s7519_s1 + $0x18c] ss:$16 sps:$4 sm:$0xff]  }
  0x12   :  { %v567_v54 = vrot.slane %v5920_v52, %v5909_v49  ;;  %v4980_v56 = vld [vmem:[%s7519_s1 + $0x184] ss:$16 sps:$4 sm:$0xff]   ;;  %v4984_v59 = vld [vmem:[%s7519_s1 + $0x180] ss:$16 sps:$4 sm:$0xff]   ;;  %v4985_v61 = vld [vmem:[%s7519_s1 + $0x188] ss:$16 sps:$4 sm:$0xff]  }
  0x13   :  { %3243 = vmatpush1.bf16.msra.mxu0 %v4936_v18  ;;  %3571 = vmatpush1.bf16.msra.mxu1 %v4937_v19  ;;  %v4986_v62 = vld [vmem:[%s7519_s1 + $0x1a4] ss:$16 sps:$4 sm:$0xff]   ;;  %v4988_v63 = vld [vmem:[%s7519_s1 + $0x1ac] ss:$16 sps:$4 sm:$0xff]   ;;  %v4990_v0 = vld [vmem:[%s7519_s1 + $0x1a0] ss:$16 sps:$4 sm:$0xff]  }
  0x14   :  { %3244 = vmatprep.subr.bf16.mxu0 %v4938_v20  ;;  %3572 = vmatprep.subr.bf16.mxu1 %v4940_v21  ;;  %v575_v58 = vcombine.high %v567_v54, %v567_v54  ;;  %v4991_v1 = vld [vmem:[%s7519_s1 + $0x1a8] ss:$16 sps:$4 sm:$0xff]   ;;  %v4992_v2 = vld [vmem:[%s7519_s1 + $0x1c4] ss:$16 sps:$4 sm:$0xff]   ;;  %v4994_v3 = vld [vmem:[%s7519_s1 + $0x1cc] ss:$16 sps:$4 sm:$0xff]   ;;  %v5989_v13 = vrot.slane %v567_v54, %v5909_v49 }
  0x15   :  { %v4996_v4 = vld [vmem:[%s7519_s1 + $0x1c0] ss:$16 sps:$4 sm:$0xff]   ;;  %v4997_v5 = vld [vmem:[%s7519_s1 + $0x1c8] ss:$16 sps:$4 sm:$0xff]   ;;  %v4998_v6 = vld [vmem:[%s7519_s1 + $0x1e4] ss:$16 sps:$4 sm:$0xff]  }
  0x16   :  { %v597_v60 = vrot.slane %v575_v58, %v5909_v49  ;;  %v5000_v7 = vld [vmem:[%s7519_s1 + $0x1ec] ss:$16 sps:$4 sm:$0xff]   ;;  %v5002_v8 = vld [vmem:[%s7519_s1 + $0x1e0] ss:$16 sps:$4 sm:$0xff]   ;;  %v5003_v9 = vld [vmem:[%s7519_s1 + $0x1e8] ss:$16 sps:$4 sm:$0xff]  }
  0x17   :  { %3245 = vmatpush1.bf16.msra.mxu0 %v4942_v22  ;;  %3573 = vmatpush1.bf16.msra.mxu1 %v4943_v23  ;;  %v5006_v10 = vld [vmem:[%s7519_s1 + $0x204] ss:$16 sps:$4 sm:$0xff]   ;;  %v5009_v11 = vld [vmem:[%s7519_s1 + $0x20c] ss:$16 sps:$4 sm:$0xff]   ;;  %v5004_v12 = vld [vmem:[%s7519_s1 + $0x200] ss:$16 sps:$4 sm:$0xff]  }
  0x18   :  { %3246 = vmatprep.subr.bf16.mxu0 %v4944_v24  ;;  %3574 = vmatprep.subr.bf16.mxu1 %v4946_v25  ;;  %v5007_v14 = vld [vmem:[%s7519_s1 + $0x208] ss:$16 sps:$4 sm:$0xff]   ;;  %v5012_v15 = vld [vmem:[%s7519_s1 + $0x224] ss:$16 sps:$4 sm:$0xff]   ;;  %v5015_v16 = vld [vmem:[%s7519_s1 + $0x22c] ss:$16 sps:$4 sm:$0xff]   ;;  %v607_v17 = vcombine.high %v597_v60, %v597_v60 }
  0x19   :  { %3266 = vmatprep.mubr.bf16.mxu0 %v597_v60  ;;  %3594 = vmatprep.mubr.bf16.mxu1 %v597_v60  ;;  %v5010_v18 = vld [vmem:[%s7519_s1 + $0x220] ss:$16 sps:$4 sm:$0xff]   ;;  %v5013_v19 = vld [vmem:[%s7519_s1 + $0x228] ss:$16 sps:$4 sm:$0xff]   ;;  %v5018_v20 = vld [vmem:[%s7519_s1 + $0x244] ss:$16 sps:$4 sm:$0xff]  }
  0x1a   :  { %v5021_v21 = vld [vmem:[%s7519_s1 + $0x24c] ss:$16 sps:$4 sm:$0xff]   ;;  %v5016_v22 = vld [vmem:[%s7519_s1 + $0x240] ss:$16 sps:$4 sm:$0xff]   ;;  %v5019_v23 = vld [vmem:[%s7519_s1 + $0x248] ss:$16 sps:$4 sm:$0xff]  }
  0x1b   :  { %3247 = vmatpush1.bf16.msra.mxu0 %v4948_v26  ;;  %3575 = vmatpush1.bf16.msra.mxu1 %v4949_v27  ;;  %v5024_v24 = vld [vmem:[%s7519_s1 + $0x264] ss:$16 sps:$4 sm:$0xff]   ;;  %v5027_v25 = vld [vmem:[%s7519_s1 + $0x26c] ss:$16 sps:$4 sm:$0xff]   ;;  %v5022_v26 = vld [vmem:[%s7519_s1 + $0x260] ss:$16 sps:$4 sm:$0xff]  }
  0x1c   :  { %3248 = vmatprep.subr.bf16.mxu0 %v4950_v28  ;;  %3576 = vmatprep.subr.bf16.mxu1 %v4952_v29  ;;  %v5025_v27 = vld [vmem:[%s7519_s1 + $0x268] ss:$16 sps:$4 sm:$0xff]   ;;  %v5030_v28 = vld [vmem:[%s7519_s1 + $0x284] ss:$16 sps:$4 sm:$0xff]   ;;  %v5033_v29 = vld [vmem:[%s7519_s1 + $0x28c] ss:$16 sps:$4 sm:$0xff]  }
  0x1d   :  { %v5042_v36 = vld [vmem:[%s7519_s1 + $0x2c4] ss:$16 sps:$4 sm:$0xff]   ;;  %v5045_v37 = vld [vmem:[%s7519_s1 + $0x2cc] ss:$16 sps:$4 sm:$0xff]   ;;  %v5040_v38 = vld [vmem:[%s7519_s1 + $0x2c0] ss:$16 sps:$4 sm:$0xff]  }
  0x1e   :  { %v5046_v43 = vld [vmem:[%s7519_s1 + $0x2e0] ss:$16 sps:$4 sm:$0xff]   ;;  %v5061_v54 = vld [vmem:[%s7519_s1 + $0x328] ss:$16 sps:$4 sm:$0xff]   ;;  %v5075_v60 = vld [vmem:[%s7519_s1 + $0x36c] ss:$16 sps:$4 sm:$0xff]  }
  0x1f   :  { %3249 = vmatpush1.bf16.msra.mxu0 %v4954_v30  ;;  %3577 = vmatpush1.bf16.msra.mxu1 %v4955_v31  ;;  %v5028_v30 = vld [vmem:[%s7519_s1 + $0x280] ss:$16 sps:$4 sm:$0xff]   ;;  %v5031_v31 = vld [vmem:[%s7519_s1 + $0x288] ss:$16 sps:$4 sm:$0xff]  }
  0x20   :  { %3250 = vmatprep.subr.bf16.mxu0 %v4956_v32  ;;  %3578 = vmatprep.subr.bf16.mxu1 %v4958_v33  ;;  %v5036_v32 = vld [vmem:[%s7519_s1 + $0x2a4] ss:$16 sps:$4 sm:$0xff]   ;;  %v5039_v33 = vld [vmem:[%s7519_s1 + $0x2ac] ss:$16 sps:$4 sm:$0xff]   ;;  %v5067_v58 = vld [vmem:[%s7519_s1 + $0x348] ss:$16 sps:$4 sm:$0xff]  }
  0x23   :  { %3251 = vmatpush1.bf16.msra.mxu0 %v4960_v34  ;;  %3579 = vmatpush1.bf16.msra.mxu1 %v4961_v35  ;;  %v5034_v34 = vld [vmem:[%s7519_s1 + $0x2a0] ss:$16 sps:$4 sm:$0xff]   ;;  %v5037_v35 = vld [vmem:[%s7519_s1 + $0x2a8] ss:$16 sps:$4 sm:$0xff]  }
  0x24   :  { %3252 = vmatprep.subr.bf16.mxu0 %v4962_v39  ;;  %3580 = vmatprep.subr.bf16.mxu1 %v4964_v40  ;;  %v5043_v39 = vld [vmem:[%s7519_s1 + $0x2c8] ss:$16 sps:$4 sm:$0xff]   ;;  %v5048_v40 = vld [vmem:[%s7519_s1 + $0x2e4] ss:$16 sps:$4 sm:$0xff]  }
  0x27   :  { %3253 = vmatpush1.bf16.msra.mxu0 %v4966_v41  ;;  %3581 = vmatpush1.bf16.msra.mxu1 %v4967_v44  ;;  %v5051_v41 = vld [vmem:[%s7519_s1 + $0x2ec] ss:$16 sps:$4 sm:$0xff]   ;;  %v5049_v44 = vld [vmem:[%s7519_s1 + $0x2e8] ss:$16 sps:$4 sm:$0xff]  }
  0x28   :  { %3254 = vmatprep.subr.bf16.mxu0 %v4968_v45  ;;  %3582 = vmatprep.subr.bf16.mxu1 %v4970_v46  ;;  %v5054_v45 = vld [vmem:[%s7519_s1 + $0x304] ss:$16 sps:$4 sm:$0xff]   ;;  %v5057_v46 = vld [vmem:[%s7519_s1 + $0x30c] ss:$16 sps:$4 sm:$0xff]  }
  0x2b   :  { %3255 = vmatpush1.bf16.msra.mxu0 %v4972_v47  ;;  %3583 = vmatpush1.bf16.msra.mxu1 %v4973_v48  ;;  %v5052_v47 = vld [vmem:[%s7519_s1 + $0x300] ss:$16 sps:$4 sm:$0xff]   ;;  %v5055_v48 = vld [vmem:[%s7519_s1 + $0x308] ss:$16 sps:$4 sm:$0xff]  }
  0x2c   :  { %3256 = vmatprep.subr.bf16.mxu0 %v4974_v50  ;;  %3584 = vmatprep.subr.bf16.mxu1 %v4976_v51  ;;  %v5060_v50 = vld [vmem:[%s7519_s1 + $0x324] ss:$16 sps:$4 sm:$0xff]   ;;  %v5063_v51 = vld [vmem:[%s7519_s1 + $0x32c] ss:$16 sps:$4 sm:$0xff]  }
  0x2f   :  { %3257 = vmatpush1.bf16.msra.mxu0 %v4978_v53  ;;  %3585 = vmatpush1.bf16.msra.mxu1 %v4979_v55  ;;  %v5058_v53 = vld [vmem:[%s7519_s1 + $0x320] ss:$16 sps:$4 sm:$0xff]   ;;  %v5066_v55 = vld [vmem:[%s7519_s1 + $0x344] ss:$16 sps:$4 sm:$0xff]  }
  0x30   :  { %3258 = vmatprep.subr.bf16.mxu0 %v4980_v56  ;;  %3586 = vmatprep.subr.bf16.mxu1 %v4982_v57  ;;  %v5069_v56 = vld [vmem:[%s7519_s1 + $0x34c] ss:$16 sps:$4 sm:$0xff]   ;;  %v5064_v57 = vld [vmem:[%s7519_s1 + $0x340] ss:$16 sps:$4 sm:$0xff]  }
  0x33   :  { %3259 = vmatpush1.bf16.msra.mxu0 %v4984_v59  ;;  %3587 = vmatpush1.bf16.msra.mxu1 %v4985_v61  ;;  %v5072_v59 = vld [vmem:[%s7519_s1 + $0x364] ss:$16 sps:$4 sm:$0xff]   ;;  %v5070_v61 = vld [vmem:[%s7519_s1 + $0x360] ss:$16 sps:$4 sm:$0xff]  }
  0x34   :  { %3260 = vmatprep.subr.bf16.mxu0 %v4986_v62  ;;  %3588 = vmatprep.subr.bf16.mxu1 %v4988_v63  ;;  %v5073_v62 = vld [vmem:[%s7519_s1 + $0x368] ss:$16 sps:$4 sm:$0xff]   ;;  %v5078_v63 = vld [vmem:[%s7519_s1 + $0x384] ss:$16 sps:$4 sm:$0xff]  }
  0x37   :  { %3261 = vmatpush1.bf16.msra.mxu0 %v4990_v0  ;;  %3589 = vmatpush1.bf16.msra.mxu1 %v4991_v1  ;;  %v5081_v0 = vld [vmem:[%s7519_s1 + $0x38c] ss:$16 sps:$4 sm:$0xff]   ;;  %v5076_v1 = vld [vmem:[%s7519_s1 + $0x380] ss:$16 sps:$4 sm:$0xff]  }
  0x38   :  { %3262 = vmatprep.subr.bf16.mxu0 %v4992_v2  ;;  %3590 = vmatprep.subr.bf16.mxu1 %v4994_v3  ;;  %v5079_v2 = vld [vmem:[%s7519_s1 + $0x388] ss:$16 sps:$4 sm:$0xff]   ;;  %v5084_v3 = vld [vmem:[%s7519_s1 + $0x3a4] ss:$16 sps:$4 sm:$0xff]  }
  0x3b   :  { %3263 = vmatpush1.bf16.msra.mxu0 %v4996_v4  ;;  %3591 = vmatpush1.bf16.msra.mxu1 %v4997_v5  ;;  %v5087_v4 = vld [vmem:[%s7519_s1 + $0x3ac] ss:$16 sps:$4 sm:$0xff]   ;;  %v5082_v5 = vld [vmem:[%s7519_s1 + $0x3a0] ss:$16 sps:$4 sm:$0xff]  }
  0x3c   :  { %3264 = vmatprep.subr.bf16.mxu0 %v4998_v6  ;;  %3592 = vmatprep.subr.bf16.mxu1 %v5000_v7  ;;  %v5085_v6 = vld [vmem:[%s7519_s1 + $0x3a8] ss:$16 sps:$4 sm:$0xff]   ;;  %v5090_v7 = vld [vmem:[%s7519_s1 + $0x3c4] ss:$16 sps:$4 sm:$0xff]  }
  0x3f   :  { %3265 = vmatpush1.bf16.msra.mxu0 %v5002_v8  ;;  %3593 = vmatpush1.bf16.msra.mxu1 %v5003_v9  ;;  %v5093_v8 = vld [vmem:[%s7519_s1 + $0x3cc] ss:$16 sps:$4 sm:$0xff]   ;;  %v560_v9 = vcombine.high %v5920_v52, %v5920_v52 }
  0x40   :  { %3275 = vmatprep.subr.bf16.mxu0 %v5006_v10  ;;  %3603 = vmatprep.subr.bf16.mxu1 %v5009_v11  ;;  %v5088_v10 = vld [vmem:[%s7519_s1 + $0x3c0] ss:$16 sps:$4 sm:$0xff]   ;;  %v5091_v11 = vld [vmem:[%s7519_s1 + $0x3c8] ss:$16 sps:$4 sm:$0xff]   ;;  %v5099_v52 = vld [vmem:[%s7519_s1 + $0x3ec] ss:$16 sps:$4 sm:$0xff]  }
  0x42   :  { %3267 = vmatmul.mubr.bf16.vlgmr.msra.gmra.mrb[0].mxu0 %v5989_v13  ;;  %3595 = vmatmul.mubr.bf16.vlgmr.msra.gmra.mrb[0].mxu1 %v5989_v13 }
  0x43   :  { %3276 = vmatpush1.bf16.msra.mxu0 %v5004_v12  ;;  %3604 = vmatpush1.bf16.msra.mxu1 %v5007_v14  ;;  %v5096_v12 = vld [vmem:[%s7519_s1 + $0x3e4] ss:$16 sps:$4 sm:$0xff]   ;;  %v6173_v14 = vrot.slane %v560_v9, %v5909_v49  ;;  %v5175_v9 = vld [vmem:[%s7519_s1 + $0x588] ss:$16 sps:$4 sm:$0xff]  }
  0x44   :  { %3277 = vmatprep.subr.bf16.mxu0 %v5012_v15  ;;  %3605 = vmatprep.subr.bf16.mxu1 %v5015_v16  ;;  %v5094_v15 = vld [vmem:[%s7519_s1 + $0x3e0] ss:$16 sps:$4 sm:$0xff]   ;;  %v5097_v16 = vld [vmem:[%s7519_s1 + $0x3e8] ss:$16 sps:$4 sm:$0xff]  }
  0x45   :  { %3307 = vmatprep.mubr.bf16.mxu0 %v607_v17  ;;  %3635 = vmatprep.mubr.bf16.mxu1 %v607_v17  ;;  %v5102_v17 = vld [vmem:[%s7519_s1 + $0x404] ss:$16 sps:$4 sm:$0xff]  }
  0x47   :  { %3278 = vmatpush1.bf16.msra.mxu0 %v5010_v18  ;;  %3606 = vmatpush1.bf16.msra.mxu1 %v5013_v19  ;;  %v5105_v18 = vld [vmem:[%s7519_s1 + $0x40c] ss:$16 sps:$4 sm:$0xff]   ;;  %v576_v19 = vcombine.high %v6173_v14, %v6173_v14 }
  0x48   :  { %3279 = vmatprep.subr.bf16.mxu0 %v5018_v20  ;;  %3607 = vmatprep.subr.bf16.mxu1 %v5021_v21  ;;  %v5100_v20 = vld [vmem:[%s7519_s1 + $0x400] ss:$16 sps:$4 sm:$0xff]   ;;  %v605_v21 = vcombine.high %v5989_v13, %v5989_v13 }
  0x49   :  { %v5106_v13 = vld [vmem:[%s7519_s1 + $0x420] ss:$16 sps:$4 sm:$0xff]  }
  0x4b   :  { %3280 = vmatpush1.bf16.msra.mxu0 %v5016_v22  ;;  %3608 = vmatpush1.bf16.msra.mxu1 %v5019_v23  ;;  %v5103_v22 = vld [vmem:[%s7519_s1 + $0x408] ss:$16 sps:$4 sm:$0xff]   ;;  %v5108_v23 = vld [vmem:[%s7519_s1 + $0x424] ss:$16 sps:$4 sm:$0xff]  }
  0x4c   :  { %3281 = vmatprep.subr.bf16.mxu0 %v5024_v24  ;;  %3609 = vmatprep.subr.bf16.mxu1 %v5027_v25  ;;  %v5111_v24 = vld [vmem:[%s7519_s1 + $0x42c] ss:$16 sps:$4 sm:$0xff]   ;;  %v6204_v25 = vrot.slane %v576_v19, %v5909_v49  ;;  %v5192_v19 = vld [vmem:[%s7519_s1 + $0x5e4] ss:$16 sps:$4 sm:$0xff]  }
  0x4f   :  { %3282 = vmatpush1.bf16.msra.mxu0 %v5022_v26  ;;  %3610 = vmatpush1.bf16.msra.mxu1 %v5025_v27  ;;  %v5109_v26 = vld [vmem:[%s7519_s1 + $0x428] ss:$16 sps:$4 sm:$0xff]   ;;  %v5114_v27 = vld [vmem:[%s7519_s1 + $0x444] ss:$16 sps:$4 sm:$0xff]  }
  0x50   :  { %3283 = vmatprep.subr.bf16.mxu0 %v5030_v28  ;;  %3611 = vmatprep.subr.bf16.mxu1 %v5033_v29  ;;  %v5117_v28 = vld [vmem:[%s7519_s1 + $0x44c] ss:$16 sps:$4 sm:$0xff]   ;;  %v5112_v29 = vld [vmem:[%s7519_s1 + $0x440] ss:$16 sps:$4 sm:$0xff]  }
  0x53   :  { %3284 = vmatpush1.bf16.msra.mxu0 %v5028_v30  ;;  %3612 = vmatpush1.bf16.msra.mxu1 %v5031_v31  ;;  %v5115_v30 = vld [vmem:[%s7519_s1 + $0x448] ss:$16 sps:$4 sm:$0xff]   ;;  %v5120_v31 = vld [vmem:[%s7519_s1 + $0x464] ss:$16 sps:$4 sm:$0xff]  }
  0x54   :  { %3285 = vmatprep.subr.bf16.mxu0 %v5036_v32  ;;  %3613 = vmatprep.subr.bf16.mxu1 %v5039_v33  ;;  %v5123_v32 = vld [vmem:[%s7519_s1 + $0x46c] ss:$16 sps:$4 sm:$0xff]   ;;  %v5118_v33 = vld [vmem:[%s7519_s1 + $0x460] ss:$16 sps:$4 sm:$0xff]  }
  0x57   :  { %3286 = vmatpush1.bf16.msra.mxu0 %v5034_v34  ;;  %3614 = vmatpush1.bf16.msra.mxu1 %v5037_v35  ;;  %v5121_v34 = vld [vmem:[%s7519_s1 + $0x468] ss:$16 sps:$4 sm:$0xff]   ;;  %v5126_v35 = vld [vmem:[%s7519_s1 + $0x484] ss:$16 sps:$4 sm:$0xff]  }
  0x58   :  { %3287 = vmatprep.subr.bf16.mxu0 %v5042_v36  ;;  %3615 = vmatprep.subr.bf16.mxu1 %v5045_v37  ;;  %v5129_v36 = vld [vmem:[%s7519_s1 + $0x48c] ss:$16 sps:$4 sm:$0xff]   ;;  %v5124_v37 = vld [vmem:[%s7519_s1 + $0x480] ss:$16 sps:$4 sm:$0xff]  }
  0x5b   :  { %3288 = vmatpush1.bf16.msra.mxu0 %v5040_v38  ;;  %3616 = vmatpush1.bf16.msra.mxu1 %v5043_v39  ;;  %v5127_v38 = vld [vmem:[%s7519_s1 + $0x488] ss:$16 sps:$4 sm:$0xff]   ;;  %v5132_v39 = vld [vmem:[%s7519_s1 + $0x4a4] ss:$16 sps:$4 sm:$0xff]  }
  0x5c   :  { %3289 = vmatprep.subr.bf16.mxu0 %v5048_v40  ;;  %3617 = vmatprep.subr.bf16.mxu1 %v5051_v41  ;;  %v5135_v40 = vld [vmem:[%s7519_s1 + $0x4ac] ss:$16 sps:$4 sm:$0xff]   ;;  %v5130_v41 = vld [vmem:[%s7519_s1 + $0x4a0] ss:$16 sps:$4 sm:$0xff]  }
  0x5f   :  { %3290 = vmatpush1.bf16.msra.mxu0 %v5046_v43  ;;  %3618 = vmatpush1.bf16.msra.mxu1 %v5049_v44  ;;  %v5133_v43 = vld [vmem:[%s7519_s1 + $0x4a8] ss:$16 sps:$4 sm:$0xff]   ;;  %v5138_v44 = vld [vmem:[%s7519_s1 + $0x4c4] ss:$16 sps:$4 sm:$0xff]  }
  0x60   :  { %3291 = vmatprep.subr.bf16.mxu0 %v5054_v45  ;;  %3619 = vmatprep.subr.bf16.mxu1 %v5057_v46  ;;  %v5141_v45 = vld [vmem:[%s7519_s1 + $0x4cc] ss:$16 sps:$4 sm:$0xff]   ;;  %v5136_v46 = vld [vmem:[%s7519_s1 + $0x4c0] ss:$16 sps:$4 sm:$0xff]  }
  0x63   :  { %3292 = vmatpush1.bf16.msra.mxu0 %v5052_v47  ;;  %3620 = vmatpush1.bf16.msra.mxu1 %v5055_v48  ;;  %v5139_v47 = vld [vmem:[%s7519_s1 + $0x4c8] ss:$16 sps:$4 sm:$0xff]   ;;  %v5144_v48 = vld [vmem:[%s7519_s1 + $0x4e4] ss:$16 sps:$4 sm:$0xff]  }
  0x64   :  { %3293 = vmatprep.subr.bf16.mxu0 %v5060_v50  ;;  %3621 = vmatprep.subr.bf16.mxu1 %v5063_v51  ;;  %v5147_v50 = vld [vmem:[%s7519_s1 + $0x4ec] ss:$16 sps:$4 sm:$0xff]   ;;  %v5142_v51 = vld [vmem:[%s7519_s1 + $0x4e0] ss:$16 sps:$4 sm:$0xff]  }
  0x67   :  { %3294 = vmatpush1.bf16.msra.mxu0 %v5058_v53  ;;  %3622 = vmatpush1.bf16.msra.mxu1 %v5061_v54  ;;  %v5145_v53 = vld [vmem:[%s7519_s1 + $0x4e8] ss:$16 sps:$4 sm:$0xff]   ;;  %v5150_v54 = vld [vmem:[%s7519_s1 + $0x504] ss:$16 sps:$4 sm:$0xff]  }
  0x68   :  { %3295 = vmatprep.subr.bf16.mxu0 %v5066_v55  ;;  %3623 = vmatprep.subr.bf16.mxu1 %v5069_v56  ;;  %v5153_v55 = vld [vmem:[%s7519_s1 + $0x50c] ss:$16 sps:$4 sm:$0xff]   ;;  %v5148_v56 = vld [vmem:[%s7519_s1 + $0x500] ss:$16 sps:$4 sm:$0xff]  }
  0x6b   :  { %3296 = vmatpush1.bf16.msra.mxu0 %v5064_v57  ;;  %3624 = vmatpush1.bf16.msra.mxu1 %v5067_v58  ;;  %v5151_v57 = vld [vmem:[%s7519_s1 + $0x508] ss:$16 sps:$4 sm:$0xff]   ;;  %v5156_v58 = vld [vmem:[%s7519_s1 + $0x524] ss:$16 sps:$4 sm:$0xff]  }
  0x6c   :  { %3297 = vmatprep.subr.bf16.mxu0 %v5072_v59  ;;  %3625 = vmatprep.subr.bf16.mxu1 %v5075_v60  ;;  %v5159_v59 = vld [vmem:[%s7519_s1 + $0x52c] ss:$16 sps:$4 sm:$0xff]   ;;  %v5154_v60 = vld [vmem:[%s7519_s1 + $0x520] ss:$16 sps:$4 sm:$0xff]  }
  0x6f   :  { %3298 = vmatpush1.bf16.msra.mxu0 %v5070_v61  ;;  %3626 = vmatpush1.bf16.msra.mxu1 %v5073_v62  ;;  %v5157_v61 = vld [vmem:[%s7519_s1 + $0x528] ss:$16 sps:$4 sm:$0xff]   ;;  %v5162_v62 = vld [vmem:[%s7519_s1 + $0x544] ss:$16 sps:$4 sm:$0xff]  }
  0x70   :  { %3299 = vmatprep.subr.bf16.mxu0 %v5078_v63  ;;  %3627 = vmatprep.subr.bf16.mxu1 %v5081_v0  ;;  %v5165_v63 = vld [vmem:[%s7519_s1 + $0x54c] ss:$16 sps:$4 sm:$0xff]   ;;  %v5160_v0 = vld [vmem:[%s7519_s1 + $0x540] ss:$16 sps:$4 sm:$0xff]  }
  0x73   :  { %3300 = vmatpush1.bf16.msra.mxu0 %v5076_v1  ;;  %3628 = vmatpush1.bf16.msra.mxu1 %v5079_v2  ;;  %v5163_v1 = vld [vmem:[%s7519_s1 + $0x548] ss:$16 sps:$4 sm:$0xff]   ;;  %v5168_v2 = vld [vmem:[%s7519_s1 + $0x564] ss:$16 sps:$4 sm:$0xff]  }
  0x74   :  { %3301 = vmatprep.subr.bf16.mxu0 %v5084_v3  ;;  %3629 = vmatprep.subr.bf16.mxu1 %v5087_v4  ;;  %v5171_v3 = vld [vmem:[%s7519_s1 + $0x56c] ss:$16 sps:$4 sm:$0xff]   ;;  %v5166_v4 = vld [vmem:[%s7519_s1 + $0x560] ss:$16 sps:$4 sm:$0xff]  }
  0x77   :  { %3302 = vmatpush1.bf16.msra.mxu0 %v5082_v5  ;;  %3630 = vmatpush1.bf16.msra.mxu1 %v5085_v6  ;;  %v5169_v5 = vld [vmem:[%s7519_s1 + $0x568] ss:$16 sps:$4 sm:$0xff]   ;;  %v5174_v6 = vld [vmem:[%s7519_s1 + $0x584] ss:$16 sps:$4 sm:$0xff]  }
  0x78   :  { %3303 = vmatprep.subr.bf16.mxu0 %v5090_v7  ;;  %3631 = vmatprep.subr.bf16.mxu1 %v5093_v8  ;;  %v5177_v7 = vld [vmem:[%s7519_s1 + $0x58c] ss:$16 sps:$4 sm:$0xff]   ;;  %v5172_v8 = vld [vmem:[%s7519_s1 + $0x580] ss:$16 sps:$4 sm:$0xff]  }
  0x7b   :  { %3304 = vmatpush1.bf16.msra.mxu0 %v5088_v10  ;;  %3632 = vmatpush1.bf16.msra.mxu1 %v5091_v11  ;;  %v5180_v10 = vld [vmem:[%s7519_s1 + $0x5a4] ss:$16 sps:$4 sm:$0xff]   ;;  %v5183_v11 = vld [vmem:[%s7519_s1 + $0x5ac] ss:$16 sps:$4 sm:$0xff]  }
  0x7c   :  { %3305 = vmatprep.subr.bf16.mxu0 %v5096_v12  ;;  %3633 = vmatprep.subr.bf16.mxu1 %v5099_v52  ;;  %v5178_v12 = vld [vmem:[%s7519_s1 + $0x5a0] ss:$16 sps:$4 sm:$0xff]   ;;  %v5181_v52 = vld [vmem:[%s7519_s1 + $0x5a8] ss:$16 sps:$4 sm:$0xff]  }
  0x7f   :  { %3306 = vmatpush1.bf16.msra.mxu0 %v5094_v15  ;;  %3634 = vmatpush1.bf16.msra.mxu1 %v5097_v16  ;;  %v5186_v15 = vld [vmem:[%s7519_s1 + $0x5c4] ss:$16 sps:$4 sm:$0xff]   ;;  %v5189_v16 = vld [vmem:[%s7519_s1 + $0x5cc] ss:$16 sps:$4 sm:$0xff]  }
  0x80   :  { %3316 = vmatprep.subr.bf16.mxu0 %v5102_v17  ;;  %3644 = vmatprep.subr.bf16.mxu1 %v5105_v18  ;;  %v5184_v17 = vld [vmem:[%s7519_s1 + $0x5c0] ss:$16 sps:$4 sm:$0xff]   ;;  %v5187_v18 = vld [vmem:[%s7519_s1 + $0x5c8] ss:$16 sps:$4 sm:$0xff]  }
  0x82   :  { %3308 = vmatmul.mubr.bf16.vlgmr.msra.gmra.mrb[0].mxu0 %v605_v21  ;;  %3636 = vmatmul.mubr.bf16.vlgmr.msra.gmra.mrb[0].mxu1 %v605_v21  ;;  %v5190_v21 = vld [vmem:[%s7519_s1 + $0x5e0] ss:$16 sps:$4 sm:$0xff]  }
  0x83   :  { %3317 = vmatpush1.bf16.msra.mxu0 %v5100_v20  ;;  %3645 = vmatpush1.bf16.msra.mxu1 %v5103_v22  ;;  %v5195_v20 = vld [vmem:[%s7519_s1 + $0x5ec] ss:$16 sps:$4 sm:$0xff]   ;;  %v5193_v22 = vld [vmem:[%s7519_s1 + $0x5e8] ss:$16 sps:$4 sm:$0xff]  }
  0x84   :  { %3318 = vmatprep.subr.bf16.mxu0 %v5108_v23  ;;  %3646 = vmatprep.subr.bf16.mxu1 %v5111_v24  ;;  %v5199_v23 = vld [vmem:[%s7519_s1 + $0x604] ss:$16 sps:$4 sm:$0xff]   ;;  %v5202_v24 = vld [vmem:[%s7519_s1 + $0x60c] ss:$16 sps:$4 sm:$0xff]  }
  0x85   :  { %3348 = vmatprep.mubr.bf16.mxu0 %v6204_v25  ;;  %3676 = vmatprep.mubr.bf16.mxu1 %v6204_v25 }
  0x87   :  { %3319 = vmatpush1.bf16.msra.mxu0 %v5106_v13  ;;  %3647 = vmatpush1.bf16.msra.mxu1 %v5109_v26  ;;  %v5197_v13 = vld [vmem:[%s7519_s1 + $0x600] ss:$16 sps:$4 sm:$0xff]   ;;  %v6393_v26 = vrot.slane %v6173_v14, %v5909_v49  ;;  %v608_v14 = vcombine.high %v6204_v25, %v6204_v25  ;;  %v5211_v25 = vld [vmem:[%s7519_s1 + $0x644] ss:$16 sps:$4 sm:$0xff]  }
  0x88   :  { %3320 = vmatprep.subr.bf16.mxu0 %v5114_v27  ;;  %3648 = vmatprep.subr.bf16.mxu1 %v5117_v28  ;;  %v5200_v27 = vld [vmem:[%s7519_s1 + $0x608] ss:$16 sps:$4 sm:$0xff]   ;;  %v5205_v28 = vld [vmem:[%s7519_s1 + $0x624] ss:$16 sps:$4 sm:$0xff]  }
  0x8b   :  { %3321 = vmatpush1.bf16.msra.mxu0 %v5112_v29  ;;  %3649 = vmatpush1.bf16.msra.mxu1 %v5115_v30  ;;  %v5208_v29 = vld [vmem:[%s7519_s1 + $0x62c] ss:$16 sps:$4 sm:$0xff]   ;;  %v5203_v30 = vld [vmem:[%s7519_s1 + $0x620] ss:$16 sps:$4 sm:$0xff]  }
  0x8c   :  { %3322 = vmatprep.subr.bf16.mxu0 %v5120_v31  ;;  %3650 = vmatprep.subr.bf16.mxu1 %v5123_v32  ;;  %v5206_v31 = vld [vmem:[%s7519_s1 + $0x628] ss:$16 sps:$4 sm:$0xff]   ;;  %v5214_v32 = vld [vmem:[%s7519_s1 + $0x64c] ss:$16 sps:$4 sm:$0xff]  }
  0x8f   :  { %3323 = vmatpush1.bf16.msra.mxu0 %v5118_v33  ;;  %3651 = vmatpush1.bf16.msra.mxu1 %v5121_v34  ;;  %v5209_v33 = vld [vmem:[%s7519_s1 + $0x640] ss:$16 sps:$4 sm:$0xff]   ;;  %v5212_v34 = vld [vmem:[%s7519_s1 + $0x648] ss:$16 sps:$4 sm:$0xff]  }
  0x90   :  { %3324 = vmatprep.subr.bf16.mxu0 %v5126_v35  ;;  %3652 = vmatprep.subr.bf16.mxu1 %v5129_v36  ;;  %v5217_v35 = vld [vmem:[%s7519_s1 + $0x664] ss:$16 sps:$4 sm:$0xff]   ;;  %v5220_v36 = vld [vmem:[%s7519_s1 + $0x66c] ss:$16 sps:$4 sm:$0xff]  }
  0x93   :  { %3325 = vmatpush1.bf16.msra.mxu0 %v5124_v37  ;;  %3653 = vmatpush1.bf16.msra.mxu1 %v5127_v38  ;;  %v5215_v37 = vld [vmem:[%s7519_s1 + $0x660] ss:$16 sps:$4 sm:$0xff]   ;;  %v5218_v38 = vld [vmem:[%s7519_s1 + $0x668] ss:$16 sps:$4 sm:$0xff]  }
  0x94   :  { %3326 = vmatprep.subr.bf16.mxu0 %v5132_v39  ;;  %3654 = vmatprep.subr.bf16.mxu1 %v5135_v40  ;;  %v5223_v39 = vld [vmem:[%s7519_s1 + $0x684] ss:$16 sps:$4 sm:$0xff]   ;;  %v5226_v40 = vld [vmem:[%s7519_s1 + $0x68c] ss:$16 sps:$4 sm:$0xff]  }
  0x97   :  { %3327 = vmatpush1.bf16.msra.mxu0 %v5130_v41  ;;  %3655 = vmatpush1.bf16.msra.mxu1 %v5133_v43  ;;  %v5221_v41 = vld [vmem:[%s7519_s1 + $0x680] ss:$16 sps:$4 sm:$0xff]   ;;  %v5224_v43 = vld [vmem:[%s7519_s1 + $0x688] ss:$16 sps:$4 sm:$0xff]  }
  0x98   :  { %3328 = vmatprep.subr.bf16.mxu0 %v5138_v44  ;;  %3656 = vmatprep.subr.bf16.mxu1 %v5141_v45  ;;  %v5229_v44 = vld [vmem:[%s7519_s1 + $0x6a4] ss:$16 sps:$4 sm:$0xff]   ;;  %v5232_v45 = vld [vmem:[%s7519_s1 + $0x6ac] ss:$16 sps:$4 sm:$0xff]  }
  0x9b   :  { %3329 = vmatpush1.bf16.msra.mxu0 %v5136_v46  ;;  %3657 = vmatpush1.bf16.msra.mxu1 %v5139_v47  ;;  %v5227_v46 = vld [vmem:[%s7519_s1 + $0x6a0] ss:$16 sps:$4 sm:$0xff]   ;;  %v5230_v47 = vld [vmem:[%s7519_s1 + $0x6a8] ss:$16 sps:$4 sm:$0xff]  }
  0x9c   :  { %3330 = vmatprep.subr.bf16.mxu0 %v5144_v48  ;;  %3658 = vmatprep.subr.bf16.mxu1 %v5147_v50  ;;  %v5235_v48 = vld [vmem:[%s7519_s1 + $0x6c4] ss:$16 sps:$4 sm:$0xff]   ;;  %v5238_v50 = vld [vmem:[%s7519_s1 + $0x6cc] ss:$16 sps:$4 sm:$0xff]  }
  0x9f   :  { %3331 = vmatpush1.bf16.msra.mxu0 %v5142_v51  ;;  %3659 = vmatpush1.bf16.msra.mxu1 %v5145_v53  ;;  %v5233_v51 = vld [vmem:[%s7519_s1 + $0x6c0] ss:$16 sps:$4 sm:$0xff]   ;;  %v5236_v53 = vld [vmem:[%s7519_s1 + $0x6c8] ss:$16 sps:$4 sm:$0xff]  }
  0xa0   :  { %3332 = vmatprep.subr.bf16.mxu0 %v5150_v54  ;;  %3660 = vmatprep.subr.bf16.mxu1 %v5153_v55  ;;  %v5241_v54 = vld [vmem:[%s7519_s1 + $0x6e4] ss:$16 sps:$4 sm:$0xff]   ;;  %v5244_v55 = vld [vmem:[%s7519_s1 + $0x6ec] ss:$16 sps:$4 sm:$0xff]  }
  0xa3   :  { %3333 = vmatpush1.bf16.msra.mxu0 %v5148_v56  ;;  %3661 = vmatpush1.bf16.msra.mxu1 %v5151_v57  ;;  %v5239_v56 = vld [vmem:[%s7519_s1 + $0x6e0] ss:$16 sps:$4 sm:$0xff]   ;;  %v5242_v57 = vld [vmem:[%s7519_s1 + $0x6e8] ss:$16 sps:$4 sm:$0xff]  }
  0xa4   :  { %3334 = vmatprep.subr.bf16.mxu0 %v5156_v58  ;;  %3662 = vmatprep.subr.bf16.mxu1 %v5159_v59  ;;  %v5247_v58 = vld [vmem:[%s7519_s1 + $0x704] ss:$16 sps:$4 sm:$0xff]   ;;  %v5250_v59 = vld [vmem:[%s7519_s1 + $0x70c] ss:$16 sps:$4 sm:$0xff]  }
  0xa7   :  { %3335 = vmatpush1.bf16.msra.mxu0 %v5154_v60  ;;  %3663 = vmatpush1.bf16.msra.mxu1 %v5157_v61  ;;  %v5245_v60 = vld [vmem:[%s7519_s1 + $0x700] ss:$16 sps:$4 sm:$0xff]   ;;  %v5248_v61 = vld [vmem:[%s7519_s1 + $0x708] ss:$16 sps:$4 sm:$0xff]  }
  0xa8   :  { %3336 = vmatprep.subr.bf16.mxu0 %v5162_v62  ;;  %3664 = vmatprep.subr.bf16.mxu1 %v5165_v63  ;;  %v5253_v62 = vld [vmem:[%s7519_s1 + $0x724] ss:$16 sps:$4 sm:$0xff]   ;;  %v5256_v63 = vld [vmem:[%s7519_s1 + $0x72c] ss:$16 sps:$4 sm:$0xff]  }
  0xab   :  { %3337 = vmatpush1.bf16.msra.mxu0 %v5160_v0  ;;  %3665 = vmatpush1.bf16.msra.mxu1 %v5163_v1  ;;  %v5251_v0 = vld [vmem:[%s7519_s1 + $0x720] ss:$16 sps:$4 sm:$0xff]   ;;  %v5254_v1 = vld [vmem:[%s7519_s1 + $0x728] ss:$16 sps:$4 sm:$0xff]  }
  0xac   :  { %3338 = vmatprep.subr.bf16.mxu0 %v5168_v2  ;;  %3666 = vmatprep.subr.bf16.mxu1 %v5171_v3  ;;  %v5259_v2 = vld [vmem:[%s7519_s1 + $0x744] ss:$16 sps:$4 sm:$0xff]   ;;  %v5262_v3 = vld [vmem:[%s7519_s1 + $0x74c] ss:$16 sps:$4 sm:$0xff]  }
  0xaf   :  { %3339 = vmatpush1.bf16.msra.mxu0 %v5166_v4  ;;  %3667 = vmatpush1.bf16.msra.mxu1 %v5169_v5  ;;  %v5257_v4 = vld [vmem:[%s7519_s1 + $0x740] ss:$16 sps:$4 sm:$0xff]   ;;  %v5260_v5 = vld [vmem:[%s7519_s1 + $0x748] ss:$16 sps:$4 sm:$0xff]  }
  0xb0   :  { %3340 = vmatprep.subr.bf16.mxu0 %v5174_v6  ;;  %3668 = vmatprep.subr.bf16.mxu1 %v5177_v7  ;;  %v5265_v6 = vld [vmem:[%s7519_s1 + $0x764] ss:$16 sps:$4 sm:$0xff]   ;;  %v5268_v7 = vld [vmem:[%s7519_s1 + $0x76c] ss:$16 sps:$4 sm:$0xff]  }
  0xb3   :  { %3341 = vmatpush1.bf16.msra.mxu0 %v5172_v8  ;;  %3669 = vmatpush1.bf16.msra.mxu1 %v5175_v9  ;;  %v5263_v8 = vld [vmem:[%s7519_s1 + $0x760] ss:$16 sps:$4 sm:$0xff]   ;;  %v5266_v9 = vld [vmem:[%s7519_s1 + $0x768] ss:$16 sps:$4 sm:$0xff]  }
  0xb4   :  { %3342 = vmatprep.subr.bf16.mxu0 %v5180_v10  ;;  %3670 = vmatprep.subr.bf16.mxu1 %v5183_v11  ;;  %v5271_v10 = vld [vmem:[%s7519_s1 + $0x784] ss:$16 sps:$4 sm:$0xff]   ;;  %v5274_v11 = vld [vmem:[%s7519_s1 + $0x78c] ss:$16 sps:$4 sm:$0xff]  }
  0xb7   :  { %3343 = vmatpush1.bf16.msra.mxu0 %v5178_v12  ;;  %3671 = vmatpush1.bf16.msra.mxu1 %v5181_v52  ;;  %v5269_v12 = vld [vmem:[%s7519_s1 + $0x780] ss:$16 sps:$4 sm:$0xff]   ;;  %v5272_v52 = vld [vmem:[%s7519_s1 + $0x788] ss:$16 sps:$4 sm:$0xff]  }
  0xb8   :  { %3344 = vmatprep.subr.bf16.mxu0 %v5186_v15  ;;  %3672 = vmatprep.subr.bf16.mxu1 %v5189_v16  ;;  %v5277_v15 = vld [vmem:[%s7519_s1 + $0x7a4] ss:$16 sps:$4 sm:$0xff]   ;;  %v5280_v16 = vld [vmem:[%s7519_s1 + $0x7ac] ss:$16 sps:$4 sm:$0xff]  }
  0xbb   :  { %3345 = vmatpush1.bf16.msra.mxu0 %v5184_v17  ;;  %3673 = vmatpush1.bf16.msra.mxu1 %v5187_v18  ;;  %v5275_v17 = vld [vmem:[%s7519_s1 + $0x7a0] ss:$16 sps:$4 sm:$0xff]   ;;  %v5278_v18 = vld [vmem:[%s7519_s1 + $0x7a8] ss:$16 sps:$4 sm:$0xff]  }
  0xbc   :  { %3346 = vmatprep.subr.bf16.mxu0 %v5192_v19  ;;  %3674 = vmatprep.subr.bf16.mxu1 %v5195_v20  ;;  %v5283_v19 = vld [vmem:[%s7519_s1 + $0x7c4] ss:$16 sps:$4 sm:$0xff]   ;;  %v5286_v20 = vld [vmem:[%s7519_s1 + $0x7cc] ss:$16 sps:$4 sm:$0xff]  }
  0xbf   :  { %3347 = vmatpush1.bf16.msra.mxu0 %v5190_v21  ;;  %3675 = vmatpush1.bf16.msra.mxu1 %v5193_v22  ;;  %v6567_v21 = vld [vmem:[%s7518_s0 + $0x8] sm:$0xff]  ;;  %v5281_v22 = vld [vmem:[%s7519_s1 + $0x7c0] ss:$16 sps:$4 sm:$0xff]  }
  0xc0   :  { %3357 = vmatprep.subr.bf16.mxu0 %v5199_v23  ;;  %3685 = vmatprep.subr.bf16.mxu1 %v5202_v24  ;;  %v5284_v23 = vld [vmem:[%s7519_s1 + $0x7c8] ss:$16 sps:$4 sm:$0xff]   ;;  %v5289_v24 = vld [vmem:[%s7519_s1 + $0x7e4] ss:$16 sps:$4 sm:$0xff]  }
  0xc2   :  { %3349 = vmatmul.mubr.bf16.vlgmr.msra.gmra.mrb[0].mxu0 %v6393_v26  ;;  %3677 = vmatmul.mubr.bf16.vlgmr.msra.gmra.mrb[0].mxu1 %v6393_v26 }
  0xc3   :  { %3358 = vmatpush1.bf16.msra.mxu0 %v5197_v13  ;;  %3686 = vmatpush1.bf16.msra.mxu1 %v5200_v27  ;;  %v5292_v13 = vld [vmem:[%s7519_s1 + $0x7ec] ss:$16 sps:$4 sm:$0xff]   ;;  %v6583_v27 = vrot.slane %v6567_v21, %v5909_v49 }
  0xc4   :  { %3359 = vmatprep.subr.bf16.mxu0 %v5205_v28  ;;  %3687 = vmatprep.subr.bf16.mxu1 %v5208_v29  ;;  %v5287_v28 = vld [vmem:[%s7519_s1 + $0x7e0] ss:$16 sps:$4 sm:$0xff]   ;;  %v5290_v29 = vld [vmem:[%s7519_s1 + $0x7e8] ss:$16 sps:$4 sm:$0xff]  }
  0xc5   :  { %3389 = vmatprep.mubr.bf16.mxu0 %v608_v14  ;;  %3717 = vmatprep.mubr.bf16.mxu1 %v608_v14  ;;  %v5295_v14 = vld [vmem:[%s7519_s1 + $0x804] ss:$16 sps:$4 sm:$0xff]  }
  0xc7   :  { %3360 = vmatpush1.bf16.msra.mxu0 %v5203_v30  ;;  %3688 = vmatpush1.bf16.msra.mxu1 %v5206_v31  ;;  %v5298_v30 = vld [vmem:[%s7519_s1 + $0x80c] ss:$16 sps:$4 sm:$0xff]   ;;  %v624_v31 = vcombine.high %v6583_v27, %v6583_v27 }
  0xc8   :  { %3361 = vmatprep.subr.bf16.mxu0 %v5211_v25  ;;  %3689 = vmatprep.subr.bf16.mxu1 %v5214_v32  ;;  %v606_v25 = vcombine.high %v6393_v26, %v6393_v26  ;;  %v5293_v32 = vld [vmem:[%s7519_s1 + $0x800] ss:$16 sps:$4 sm:$0xff]   ;;  %v5304_v26 = vld [vmem:[%s7519_s1 + $0x82c] ss:$16 sps:$4 sm:$0xff]  }
  0xcb   :  { %3362 = vmatpush1.bf16.msra.mxu0 %v5209_v33  ;;  %3690 = vmatpush1.bf16.msra.mxu1 %v5212_v34  ;;  %v5296_v33 = vld [vmem:[%s7519_s1 + $0x808] ss:$16 sps:$4 sm:$0xff]   ;;  %v5301_v34 = vld [vmem:[%s7519_s1 + $0x824] ss:$16 sps:$4 sm:$0xff]  }
  0xcc   :  { %3363 = vmatprep.subr.bf16.mxu0 %v5217_v35  ;;  %3691 = vmatprep.subr.bf16.mxu1 %v5220_v36  ;;  %v6614_v35 = vrot.slane %v624_v31, %v5909_v49  ;;  %v5299_v36 = vld [vmem:[%s7519_s1 + $0x820] ss:$16 sps:$4 sm:$0xff]   ;;  %v5380_v31 = vld [vmem:[%s7519_s1 + $0x9c8] ss:$16 sps:$4 sm:$0xff]  }
  0xcf   :  { %3364 = vmatpush1.bf16.msra.mxu0 %v5215_v37  ;;  %3692 = vmatpush1.bf16.msra.mxu1 %v5218_v38  ;;  %v5302_v37 = vld [vmem:[%s7519_s1 + $0x828] ss:$16 sps:$4 sm:$0xff]   ;;  %v5307_v38 = vld [vmem:[%s7519_s1 + $0x844] ss:$16 sps:$4 sm:$0xff]  }
  0xd0   :  { %3365 = vmatprep.subr.bf16.mxu0 %v5223_v39  ;;  %3693 = vmatprep.subr.bf16.mxu1 %v5226_v40  ;;  %v5310_v39 = vld [vmem:[%s7519_s1 + $0x84c] ss:$16 sps:$4 sm:$0xff]   ;;  %v5305_v40 = vld [vmem:[%s7519_s1 + $0x840] ss:$16 sps:$4 sm:$0xff]  }
  0xd3   :  { %3366 = vmatpush1.bf16.msra.mxu0 %v5221_v41  ;;  %3694 = vmatpush1.bf16.msra.mxu1 %v5224_v43  ;;  %v5308_v41 = vld [vmem:[%s7519_s1 + $0x848] ss:$16 sps:$4 sm:$0xff]   ;;  %v5313_v43 = vld [vmem:[%s7519_s1 + $0x864] ss:$16 sps:$4 sm:$0xff]  }
  0xd4   :  { %3367 = vmatprep.subr.bf16.mxu0 %v5229_v44  ;;  %3695 = vmatprep.subr.bf16.mxu1 %v5232_v45  ;;  %v5316_v44 = vld [vmem:[%s7519_s1 + $0x86c] ss:$16 sps:$4 sm:$0xff]   ;;  %v5311_v45 = vld [vmem:[%s7519_s1 + $0x860] ss:$16 sps:$4 sm:$0xff]  }
  0xd7   :  { %3368 = vmatpush1.bf16.msra.mxu0 %v5227_v46  ;;  %3696 = vmatpush1.bf16.msra.mxu1 %v5230_v47  ;;  %v5314_v46 = vld [vmem:[%s7519_s1 + $0x868] ss:$16 sps:$4 sm:$0xff]   ;;  %v5319_v47 = vld [vmem:[%s7519_s1 + $0x884] ss:$16 sps:$4 sm:$0xff]  }
  0xd8   :  { %3369 = vmatprep.subr.bf16.mxu0 %v5235_v48  ;;  %3697 = vmatprep.subr.bf16.mxu1 %v5238_v50  ;;  %v5322_v48 = vld [vmem:[%s7519_s1 + $0x88c] ss:$16 sps:$4 sm:$0xff]   ;;  %v5317_v50 = vld [vmem:[%s7519_s1 + $0x880] ss:$16 sps:$4 sm:$0xff]  }
  0xdb   :  { %3370 = vmatpush1.bf16.msra.mxu0 %v5233_v51  ;;  %3698 = vmatpush1.bf16.msra.mxu1 %v5236_v53  ;;  %v5320_v51 = vld [vmem:[%s7519_s1 + $0x888] ss:$16 sps:$4 sm:$0xff]   ;;  %v5325_v53 = vld [vmem:[%s7519_s1 + $0x8a4] ss:$16 sps:$4 sm:$0xff]  }
  0xdc   :  { %3371 = vmatprep.subr.bf16.mxu0 %v5241_v54  ;;  %3699 = vmatprep.subr.bf16.mxu1 %v5244_v55  ;;  %v5328_v54 = vld [vmem:[%s7519_s1 + $0x8ac] ss:$16 sps:$4 sm:$0xff]   ;;  %v5323_v55 = vld [vmem:[%s7519_s1 + $0x8a0] ss:$16 sps:$4 sm:$0xff]  }
  0xdf   :  { %3372 = vmatpush1.bf16.msra.mxu0 %v5239_v56  ;;  %3700 = vmatpush1.bf16.msra.mxu1 %v5242_v57  ;;  %v5326_v56 = vld [vmem:[%s7519_s1 + $0x8a8] ss:$16 sps:$4 sm:$0xff]   ;;  %v5331_v57 = vld [vmem:[%s7519_s1 + $0x8c4] ss:$16 sps:$4 sm:$0xff]  }
  0xe0   :  { %3373 = vmatprep.subr.bf16.mxu0 %v5247_v58  ;;  %3701 = vmatprep.subr.bf16.mxu1 %v5250_v59  ;;  %v5334_v58 = vld [vmem:[%s7519_s1 + $0x8cc] ss:$16 sps:$4 sm:$0xff]   ;;  %v5329_v59 = vld [vmem:[%s7519_s1 + $0x8c0] ss:$16 sps:$4 sm:$0xff]  }
  0xe3   :  { %3374 = vmatpush1.bf16.msra.mxu0 %v5245_v60  ;;  %3702 = vmatpush1.bf16.msra.mxu1 %v5248_v61  ;;  %v5332_v60 = vld [vmem:[%s7519_s1 + $0x8c8] ss:$16 sps:$4 sm:$0xff]   ;;  %v5337_v61 = vld [vmem:[%s7519_s1 + $0x8e4] ss:$16 sps:$4 sm:$0xff]  }
  0xe4   :  { %3375 = vmatprep.subr.bf16.mxu0 %v5253_v62  ;;  %3703 = vmatprep.subr.bf16.mxu1 %v5256_v63  ;;  %v5340_v62 = vld [vmem:[%s7519_s1 + $0x8ec] ss:$16 sps:$4 sm:$0xff]   ;;  %v5335_v63 = vld [vmem:[%s7519_s1 + $0x8e0] ss:$16 sps:$4 sm:$0xff]  }
  0xe7   :  { %3376 = vmatpush1.bf16.msra.mxu0 %v5251_v0  ;;  %3704 = vmatpush1.bf16.msra.mxu1 %v5254_v1  ;;  %v5338_v0 = vld [vmem:[%s7519_s1 + $0x8e8] ss:$16 sps:$4 sm:$0xff]   ;;  %v5343_v1 = vld [vmem:[%s7519_s1 + $0x904] ss:$16 sps:$4 sm:$0xff]  }
  0xe8   :  { %3377 = vmatprep.subr.bf16.mxu0 %v5259_v2  ;;  %3705 = vmatprep.subr.bf16.mxu1 %v5262_v3  ;;  %v5346_v2 = vld [vmem:[%s7519_s1 + $0x90c] ss:$16 sps:$4 sm:$0xff]   ;;  %v5341_v3 = vld [vmem:[%s7519_s1 + $0x900] ss:$16 sps:$4 sm:$0xff]  }
  0xeb   :  { %3378 = vmatpush1.bf16.msra.mxu0 %v5257_v4  ;;  %3706 = vmatpush1.bf16.msra.mxu1 %v5260_v5  ;;  %v5344_v4 = vld [vmem:[%s7519_s1 + $0x908] ss:$16 sps:$4 sm:$0xff]   ;;  %v5349_v5 = vld [vmem:[%s7519_s1 + $0x924] ss:$16 sps:$4 sm:$0xff]  }
  0xec   :  { %3379 = vmatprep.subr.bf16.mxu0 %v5265_v6  ;;  %3707 = vmatprep.subr.bf16.mxu1 %v5268_v7  ;;  %v5352_v6 = vld [vmem:[%s7519_s1 + $0x92c] ss:$16 sps:$4 sm:$0xff]   ;;  %v5347_v7 = vld [vmem:[%s7519_s1 + $0x920] ss:$16 sps:$4 sm:$0xff]  }
  0xef   :  { %3380 = vmatpush1.bf16.msra.mxu0 %v5263_v8  ;;  %3708 = vmatpush1.bf16.msra.mxu1 %v5266_v9  ;;  %v5350_v8 = vld [vmem:[%s7519_s1 + $0x928] ss:$16 sps:$4 sm:$0xff]   ;;  %v5355_v9 = vld [vmem:[%s7519_s1 + $0x944] ss:$16 sps:$4 sm:$0xff]  }
  0xf0   :  { %3381 = vmatprep.subr.bf16.mxu0 %v5271_v10  ;;  %3709 = vmatprep.subr.bf16.mxu1 %v5274_v11  ;;  %v5358_v10 = vld [vmem:[%s7519_s1 + $0x94c] ss:$16 sps:$4 sm:$0xff]   ;;  %v5353_v11 = vld [vmem:[%s7519_s1 + $0x940] ss:$16 sps:$4 sm:$0xff]  }
  0xf3   :  { %3382 = vmatpush1.bf16.msra.mxu0 %v5269_v12  ;;  %3710 = vmatpush1.bf16.msra.mxu1 %v5272_v52  ;;  %v5356_v12 = vld [vmem:[%s7519_s1 + $0x948] ss:$16 sps:$4 sm:$0xff]   ;;  %v5361_v52 = vld [vmem:[%s7519_s1 + $0x964] ss:$16 sps:$4 sm:$0xff]  }
  0xf4   :  { %3383 = vmatprep.subr.bf16.mxu0 %v5277_v15  ;;  %3711 = vmatprep.subr.bf16.mxu1 %v5280_v16  ;;  %v5364_v15 = vld [vmem:[%s7519_s1 + $0x96c] ss:$16 sps:$4 sm:$0xff]   ;;  %v5359_v16 = vld [vmem:[%s7519_s1 + $0x960] ss:$16 sps:$4 sm:$0xff]  }
  0xf7   :  { %3384 = vmatpush1.bf16.msra.mxu0 %v5275_v17  ;;  %3712 = vmatpush1.bf16.msra.mxu1 %v5278_v18  ;;  %v5362_v17 = vld [vmem:[%s7519_s1 + $0x968] ss:$16 sps:$4 sm:$0xff]   ;;  %v5367_v18 = vld [vmem:[%s7519_s1 + $0x984] ss:$16 sps:$4 sm:$0xff]  }
  0xf8   :  { %3385 = vmatprep.subr.bf16.mxu0 %v5283_v19  ;;  %3713 = vmatprep.subr.bf16.mxu1 %v5286_v20  ;;  %v5370_v19 = vld [vmem:[%s7519_s1 + $0x98c] ss:$16 sps:$4 sm:$0xff]   ;;  %v5365_v20 = vld [vmem:[%s7519_s1 + $0x980] ss:$16 sps:$4 sm:$0xff]  }
  0xfb   :  { %3386 = vmatpush1.bf16.msra.mxu0 %v5281_v22  ;;  %3714 = vmatpush1.bf16.msra.mxu1 %v5284_v23  ;;  %v5368_v22 = vld [vmem:[%s7519_s1 + $0x988] ss:$16 sps:$4 sm:$0xff]   ;;  %v5373_v23 = vld [vmem:[%s7519_s1 + $0x9a4] ss:$16 sps:$4 sm:$0xff]  }
  0xfc   :  { %3387 = vmatprep.subr.bf16.mxu0 %v5289_v24  ;;  %3715 = vmatprep.subr.bf16.mxu1 %v5292_v13  ;;  %v5376_v24 = vld [vmem:[%s7519_s1 + $0x9ac] ss:$16 sps:$4 sm:$0xff]   ;;  %v5371_v13 = vld [vmem:[%s7519_s1 + $0x9a0] ss:$16 sps:$4 sm:$0xff]  }
  0xff   :  { %3388 = vmatpush1.bf16.msra.mxu0 %v5287_v28  ;;  %3716 = vmatpush1.bf16.msra.mxu1 %v5290_v29  ;;  %v5374_v28 = vld [vmem:[%s7519_s1 + $0x9a8] ss:$16 sps:$4 sm:$0xff]   ;;  %v5379_v29 = vld [vmem:[%s7519_s1 + $0x9c4] ss:$16 sps:$4 sm:$0xff]  }
 0x100   :  { %3398 = vmatprep.subr.bf16.mxu0 %v5295_v14  ;;  %3726 = vmatprep.subr.bf16.mxu1 %v5298_v30  ;;  %v5382_v14 = vld [vmem:[%s7519_s1 + $0x9cc] ss:$16 sps:$4 sm:$0xff]   ;;  %v5377_v30 = vld [vmem:[%s7519_s1 + $0x9c0] ss:$16 sps:$4 sm:$0xff]  }
 0x102   :  { %3390 = vmatmul.mubr.bf16.vlgmr.msra.gmra.mrb[0].mxu0 %v606_v25  ;;  %3718 = vmatmul.mubr.bf16.vlgmr.msra.gmra.mrb[0].mxu1 %v606_v25  ;;  %v5385_v25 = vld [vmem:[%s7519_s1 + $0x9e4] ss:$16 sps:$4 sm:$0xff]  }
 0x103   :  { %3399 = vmatpush1.bf16.msra.mxu0 %v5293_v32  ;;  %3727 = vmatpush1.bf16.msra.mxu1 %v5296_v33  ;;  %v5388_v32 = vld [vmem:[%s7519_s1 + $0x9ec] ss:$16 sps:$4 sm:$0xff]   ;;  %v5383_v33 = vld [vmem:[%s7519_s1 + $0x9e0] ss:$16 sps:$4 sm:$0xff]  }
 0x104   :  { %3400 = vmatprep.subr.bf16.mxu0 %v5301_v34  ;;  %3728 = vmatprep.subr.bf16.mxu1 %v5304_v26  ;;  %v5386_v34 = vld [vmem:[%s7519_s1 + $0x9e8] ss:$16 sps:$4 sm:$0xff]   ;;  %v5391_v26 = vld [vmem:[%s7519_s1 + $0xa04] ss:$16 sps:$4 sm:$0xff]  }
 0x105   :  { %3430 = vmatprep.mubr.bf16.mxu0 %v6614_v35  ;;  %3758 = vmatprep.mubr.bf16.mxu1 %v6614_v35 }
 0x107   :  { %3401 = vmatpush1.bf16.msra.mxu0 %v5299_v36  ;;  %3729 = vmatpush1.bf16.msra.mxu1 %v5302_v37  ;;  %v5394_v36 = vld [vmem:[%s7519_s1 + $0xa0c] ss:$16 sps:$4 sm:$0xff]   ;;  %v6800_v37 = vrot.slane %v6583_v27, %v5909_v49 }
 0x108   :  { %3402 = vmatprep.subr.bf16.mxu0 %v5307_v38  ;;  %3730 = vmatprep.subr.bf16.mxu1 %v5310_v39  ;;  %v5389_v38 = vld [vmem:[%s7519_s1 + $0xa00] ss:$16 sps:$4 sm:$0xff]   ;;  %v5392_v39 = vld [vmem:[%s7519_s1 + $0xa08] ss:$16 sps:$4 sm:$0xff]   ;;  %v5400_v27 = vld [vmem:[%s7519_s1 + $0xa2c] ss:$16 sps:$4 sm:$0xff]  }
 0x10b   :  { %3403 = vmatpush1.bf16.msra.mxu0 %v5305_v40  ;;  %3731 = vmatpush1.bf16.msra.mxu1 %v5308_v41  ;;  %v5397_v40 = vld [vmem:[%s7519_s1 + $0xa24] ss:$16 sps:$4 sm:$0xff]   ;;  %v656_v41 = vcombine.high %v6614_v35, %v6614_v35 }
 0x10c   :  { %3404 = vmatprep.subr.bf16.mxu0 %v5313_v43  ;;  %3732 = vmatprep.subr.bf16.mxu1 %v5316_v44  ;;  %v5395_v43 = vld [vmem:[%s7519_s1 + $0xa20] ss:$16 sps:$4 sm:$0xff]   ;;  %v5398_v44 = vld [vmem:[%s7519_s1 + $0xa28] ss:$16 sps:$4 sm:$0xff]   ;;  %v5403_v35 = vld [vmem:[%s7519_s1 + $0xa44] ss:$16 sps:$4 sm:$0xff]  }
 0x10f   :  { %3405 = vmatpush1.bf16.msra.mxu0 %v5311_v45  ;;  %3733 = vmatpush1.bf16.msra.mxu1 %v5314_v46  ;;  %v5406_v45 = vld [vmem:[%s7519_s1 + $0xa4c] ss:$16 sps:$4 sm:$0xff]   ;;  %v5401_v46 = vld [vmem:[%s7519_s1 + $0xa40] ss:$16 sps:$4 sm:$0xff]  }
 0x110   :  { %3406 = vmatprep.subr.bf16.mxu0 %v5319_v47  ;;  %3734 = vmatprep.subr.bf16.mxu1 %v5322_v48  ;;  %v5404_v47 = vld [vmem:[%s7519_s1 + $0xa48] ss:$16 sps:$4 sm:$0xff]   ;;  %v5409_v48 = vld [vmem:[%s7519_s1 + $0xa64] ss:$16 sps:$4 sm:$0xff]  }
 0x113   :  { %3407 = vmatpush1.bf16.msra.mxu0 %v5317_v50  ;;  %3735 = vmatpush1.bf16.msra.mxu1 %v5320_v51  ;;  %v5412_v50 = vld [vmem:[%s7519_s1 + $0xa6c] ss:$16 sps:$4 sm:$0xff]   ;;  %v5407_v51 = vld [vmem:[%s7519_s1 + $0xa60] ss:$16 sps:$4 sm:$0xff]  }
 0x114   :  { %3408 = vmatprep.subr.bf16.mxu0 %v5325_v53  ;;  %3736 = vmatprep.subr.bf16.mxu1 %v5328_v54  ;;  %v5410_v53 = vld [vmem:[%s7519_s1 + $0xa68] ss:$16 sps:$4 sm:$0xff]   ;;  %v5415_v54 = vld [vmem:[%s7519_s1 + $0xa84] ss:$16 sps:$4 sm:$0xff]  }
 0x117   :  { %3409 = vmatpush1.bf16.msra.mxu0 %v5323_v55  ;;  %3737 = vmatpush1.bf16.msra.mxu1 %v5326_v56  ;;  %v5418_v55 = vld [vmem:[%s7519_s1 + $0xa8c] ss:$16 sps:$4 sm:$0xff]   ;;  %v5413_v56 = vld [vmem:[%s7519_s1 + $0xa80] ss:$16 sps:$4 sm:$0xff]  }
 0x118   :  { %3410 = vmatprep.subr.bf16.mxu0 %v5331_v57  ;;  %3738 = vmatprep.subr.bf16.mxu1 %v5334_v58  ;;  %v5416_v57 = vld [vmem:[%s7519_s1 + $0xa88] ss:$16 sps:$4 sm:$0xff]   ;;  %v5421_v58 = vld [vmem:[%s7519_s1 + $0xaa4] ss:$16 sps:$4 sm:$0xff]  }
 0x11b   :  { %3411 = vmatpush1.bf16.msra.mxu0 %v5329_v59  ;;  %3739 = vmatpush1.bf16.msra.mxu1 %v5332_v60  ;;  %v5424_v59 = vld [vmem:[%s7519_s1 + $0xaac] ss:$16 sps:$4 sm:$0xff]   ;;  %v5419_v60 = vld [vmem:[%s7519_s1 + $0xaa0] ss:$16 sps:$4 sm:$0xff]  }
 0x11c   :  { %3412 = vmatprep.subr.bf16.mxu0 %v5337_v61  ;;  %3740 = vmatprep.subr.bf16.mxu1 %v5340_v62  ;;  %v5422_v61 = vld [vmem:[%s7519_s1 + $0xaa8] ss:$16 sps:$4 sm:$0xff]   ;;  %v5427_v62 = vld [vmem:[%s7519_s1 + $0xac4] ss:$16 sps:$4 sm:$0xff]  }
 0x11f   :  { %3413 = vmatpush1.bf16.msra.mxu0 %v5335_v63  ;;  %3741 = vmatpush1.bf16.msra.mxu1 %v5338_v0  ;;  %v5430_v63 = vld [vmem:[%s7519_s1 + $0xacc] ss:$16 sps:$4 sm:$0xff]   ;;  %v5425_v0 = vld [vmem:[%s7519_s1 + $0xac0] ss:$16 sps:$4 sm:$0xff]  }
 0x120   :  { %3414 = vmatprep.subr.bf16.mxu0 %v5343_v1  ;;  %3742 = vmatprep.subr.bf16.mxu1 %v5346_v2  ;;  %v5428_v1 = vld [vmem:[%s7519_s1 + $0xac8] ss:$16 sps:$4 sm:$0xff]   ;;  %v5433_v2 = vld [vmem:[%s7519_s1 + $0xae4] ss:$16 sps:$4 sm:$0xff]  }
 0x123   :  { %3415 = vmatpush1.bf16.msra.mxu0 %v5341_v3  ;;  %3743 = vmatpush1.bf16.msra.mxu1 %v5344_v4  ;;  %v5436_v3 = vld [vmem:[%s7519_s1 + $0xaec] ss:$16 sps:$4 sm:$0xff]   ;;  %v5431_v4 = vld [vmem:[%s7519_s1 + $0xae0] ss:$16 sps:$4 sm:$0xff]  }
 0x124   :  { %3416 = vmatprep.subr.bf16.mxu0 %v5349_v5  ;;  %3744 = vmatprep.subr.bf16.mxu1 %v5352_v6  ;;  %v5434_v5 = vld [vmem:[%s7519_s1 + $0xae8] ss:$16 sps:$4 sm:$0xff]   ;;  %v5439_v6 = vld [vmem:[%s7519_s1 + $0xb04] ss:$16 sps:$4 sm:$0xff]  }
 0x127   :  { %3417 = vmatpush1.bf16.msra.mxu0 %v5347_v7  ;;  %3745 = vmatpush1.bf16.msra.mxu1 %v5350_v8  ;;  %v5442_v7 = vld [vmem:[%s7519_s1 + $0xb0c] ss:$16 sps:$4 sm:$0xff]   ;;  %v5437_v8 = vld [vmem:[%s7519_s1 + $0xb00] ss:$16 sps:$4 sm:$0xff]  }
 0x128   :  { %3418 = vmatprep.subr.bf16.mxu0 %v5355_v9  ;;  %3746 = vmatprep.subr.bf16.mxu1 %v5358_v10  ;;  %v5440_v9 = vld [vmem:[%s7519_s1 + $0xb08] ss:$16 sps:$4 sm:$0xff]   ;;  %v5445_v10 = vld [vmem:[%s7519_s1 + $0xb24] ss:$16 sps:$4 sm:$0xff]  }
 0x12b   :  { %3419 = vmatpush1.bf16.msra.mxu0 %v5353_v11  ;;  %3747 = vmatpush1.bf16.msra.mxu1 %v5356_v12  ;;  %v5448_v11 = vld [vmem:[%s7519_s1 + $0xb2c] ss:$16 sps:$4 sm:$0xff]  }
 0x12c   :  { %3420 = vmatprep.subr.bf16.mxu0 %v5361_v52  ;;  %3748 = vmatprep.subr.bf16.mxu1 %v5364_v15 }
 0x12f   :  { %3421 = vmatpush1.bf16.msra.mxu0 %v5359_v16  ;;  %3749 = vmatpush1.bf16.msra.mxu1 %v5362_v17 }
 0x130   :  { %3422 = vmatprep.subr.bf16.mxu0 %v5367_v18  ;;  %3750 = vmatprep.subr.bf16.mxu1 %v5370_v19 }
 0x133   :  { %3423 = vmatpush1.bf16.msra.mxu0 %v5365_v20  ;;  %3751 = vmatpush1.bf16.msra.mxu1 %v5368_v22 }
 0x134   :  { %3424 = vmatprep.subr.bf16.mxu0 %v5373_v23  ;;  %3752 = vmatprep.subr.bf16.mxu1 %v5376_v24 }
 0x137   :  { %3425 = vmatpush1.bf16.msra.mxu0 %v5371_v13  ;;  %3753 = vmatpush1.bf16.msra.mxu1 %v5374_v28 }
 0x138   :  { %3426 = vmatprep.subr.bf16.mxu0 %v5379_v29  ;;  %3754 = vmatprep.subr.bf16.mxu1 %v5382_v14 }
 0x13b   :  { %3427 = vmatpush1.bf16.msra.mxu0 %v5377_v30  ;;  %3755 = vmatpush1.bf16.msra.mxu1 %v5380_v31 }
 0x13c   :  { %3428 = vmatprep.subr.bf16.mxu0 %v5385_v25  ;;  %3756 = vmatprep.subr.bf16.mxu1 %v5388_v32 }
 0x13f   :  { %3429 = vmatpush1.bf16.msra.mxu0 %v5383_v33  ;;  %3757 = vmatpush1.bf16.msra.mxu1 %v5386_v34 }
 0x140   :  { %3439 = vmatprep.subr.bf16.mxu0 %v5391_v26  ;;  %3767 = vmatprep.subr.bf16.mxu1 %v5394_v36 }
 0x142   :  { %3431 = vmatmul.mubr.bf16.vlgmr.msra.gmra.mrb[0].mxu0 %v6800_v37  ;;  %3759 = vmatmul.mubr.bf16.vlgmr.msra.gmra.mrb[0].mxu1 %v6800_v37 }
 0x143   :  { %3440 = vmatpush1.bf16.msra.mxu0 %v5389_v38  ;;  %3768 = vmatpush1.bf16.msra.mxu1 %v5392_v39 }
 0x144   :  { %3441 = vmatprep.subr.bf16.mxu0 %v5397_v40  ;;  %3769 = vmatprep.subr.bf16.mxu1 %v5400_v27 }
 0x145   :  { %3471 = vmatprep.mubr.bf16.mxu0 %v656_v41  ;;  %3799 = vmatprep.mubr.bf16.mxu1 %v656_v41 }
 0x147   :  { %3442 = vmatpush1.bf16.msra.mxu0 %v5395_v43  ;;  %3770 = vmatpush1.bf16.msra.mxu1 %v5398_v44 }
 0x148   :  { %3443 = vmatprep.subr.bf16.mxu0 %v5403_v35  ;;  %3771 = vmatprep.subr.bf16.mxu1 %v5406_v45 }
 0x14b   :  { %3444 = vmatpush1.bf16.msra.mxu0 %v5401_v46  ;;  %3772 = vmatpush1.bf16.msra.mxu1 %v5404_v47 }
 0x14c   :  { %3445 = vmatprep.subr.bf16.mxu0 %v5409_v48  ;;  %3773 = vmatprep.subr.bf16.mxu1 %v5412_v50 }
 0x14f   :  { %3446 = vmatpush1.bf16.msra.mxu0 %v5407_v51  ;;  %3774 = vmatpush1.bf16.msra.mxu1 %v5410_v53 }
 0x150   :  { %3447 = vmatprep.subr.bf16.mxu0 %v5415_v54  ;;  %3775 = vmatprep.subr.bf16.mxu1 %v5418_v55 }
 0x153   :  { %3448 = vmatpush1.bf16.msra.mxu0 %v5413_v56  ;;  %3776 = vmatpush1.bf16.msra.mxu1 %v5416_v57 }
 0x154   :  { %3449 = vmatprep.subr.bf16.mxu0 %v5421_v58  ;;  %3777 = vmatprep.subr.bf16.mxu1 %v5424_v59 }
 0x157   :  { %3450 = vmatpush1.bf16.msra.mxu0 %v5419_v60  ;;  %3778 = vmatpush1.bf16.msra.mxu1 %v5422_v61 }
 0x158   :  { %3451 = vmatprep.subr.bf16.mxu0 %v5427_v62  ;;  %3779 = vmatprep.subr.bf16.mxu1 %v5430_v63 }
 0x15b   :  { %3452 = vmatpush1.bf16.msra.mxu0 %v5425_v0  ;;  %3780 = vmatpush1.bf16.msra.mxu1 %v5428_v1 }
 0x15c   :  { %3453 = vmatprep.subr.bf16.mxu0 %v5433_v2  ;;  %3781 = vmatprep.subr.bf16.mxu1 %v5436_v3 }
 0x15f   :  { %3454 = vmatpush1.bf16.msra.mxu0 %v5431_v4  ;;  %3782 = vmatpush1.bf16.msra.mxu1 %v5434_v5 }
 0x160   :  { %3455 = vmatprep.subr.bf16.mxu0 %v5439_v6  ;;  %3783 = vmatprep.subr.bf16.mxu1 %v5442_v7 }
 0x161   :  { %10 = vsyncpa [#allocation3], 0  ;;  %v5443_v12 = vld [vmem:[%s7519_s1 + $0xb20] ss:$16 sps:$4 sm:$0xff]   ;;  %v5446_v52 = vld [vmem:[%s7519_s1 + $0xb28] ss:$16 sps:$4 sm:$0xff]   ;;  %v609_v34 = vcombine.high %v6567_v21, %v6567_v21  ;;  %v654_v35 = vcombine.high %v6800_v37, %v6800_v37 }
 0x162   :  { %v5451_v15 = vld [vmem:[%s7519_s1 + $0xb44] ss:$16 sps:$4 sm:$0xff]   ;;  %v5454_v16 = vld [vmem:[%s7519_s1 + $0xb4c] ss:$16 sps:$4 sm:$0xff]   ;;  %v5449_v17 = vld [vmem:[%s7519_s1 + $0xb40] ss:$16 sps:$4 sm:$0xff]  }
 0x163   :  { %3456 = vmatpush1.bf16.msra.mxu0 %v5437_v8  ;;  %3784 = vmatpush1.bf16.msra.mxu1 %v5440_v9  ;;  %v5452_v18 = vld [vmem:[%s7519_s1 + $0xb48] ss:$16 sps:$4 sm:$0xff]   ;;  %v5457_v19 = vld [vmem:[%s7519_s1 + $0xb64] ss:$16 sps:$4 sm:$0xff]   ;;  %v5460_v20 = vld [vmem:[%s7519_s1 + $0xb6c] ss:$16 sps:$4 sm:$0xff]   ;;  %v6989_v39 = vrot.slane %v609_v34, %v5909_v49 }
 0x164   :  { %3457 = vmatprep.subr.bf16.mxu0 %v5445_v10  ;;  %3785 = vmatprep.subr.bf16.mxu1 %v5448_v11  ;;  %v5455_v22 = vld [vmem:[%s7519_s1 + $0xb60] ss:$16 sps:$4 sm:$0xff]   ;;  %v5458_v23 = vld [vmem:[%s7519_s1 + $0xb68] ss:$16 sps:$4 sm:$0xff]   ;;  %v5463_v24 = vld [vmem:[%s7519_s1 + $0xb84] ss:$16 sps:$4 sm:$0xff]  }
 0x165   :  { %v5466_v13 = vld [vmem:[%s7519_s1 + $0xb8c] ss:$16 sps:$4 sm:$0xff]   ;;  %v5461_v28 = vld [vmem:[%s7519_s1 + $0xb80] ss:$16 sps:$4 sm:$0xff]   ;;  %v5464_v29 = vld [vmem:[%s7519_s1 + $0xb88] ss:$16 sps:$4 sm:$0xff]   ;;  %v625_v44 = vcombine.high %v6989_v39, %v6989_v39 }
 0x166   :  { %v5469_v14 = vld [vmem:[%s7519_s1 + $0xba4] ss:$16 sps:$4 sm:$0xff]   ;;  %v5472_v30 = vld [vmem:[%s7519_s1 + $0xbac] ss:$16 sps:$4 sm:$0xff]   ;;  %v5467_v31 = vld [vmem:[%s7519_s1 + $0xba0] ss:$16 sps:$4 sm:$0xff]  }
 0x167   :  { %3458 = vmatpush1.bf16.msra.mxu0 %v5443_v12  ;;  %3786 = vmatpush1.bf16.msra.mxu1 %v5446_v52  ;;  %v5470_v25 = vld [vmem:[%s7519_s1 + $0xba8] ss:$16 sps:$4 sm:$0xff]   ;;  %v5475_v32 = vld [vmem:[%s7519_s1 + $0xbc4] ss:$16 sps:$4 sm:$0xff]   ;;  %v5478_v33 = vld [vmem:[%s7519_s1 + $0xbcc] ss:$16 sps:$4 sm:$0xff]   ;;  %v7020_v48 = vrot.slane %v625_v44, %v5909_v49 }
 0x168   :  { %3459 = vmatprep.subr.bf16.mxu0 %v5451_v15  ;;  %3787 = vmatprep.subr.bf16.mxu1 %v5454_v16  ;;  %v5473_v26 = vld [vmem:[%s7519_s1 + $0xbc0] ss:$16 sps:$4 sm:$0xff]   ;;  %v5476_v36 = vld [vmem:[%s7519_s1 + $0xbc8] ss:$16 sps:$4 sm:$0xff]   ;;  %v5481_v38 = vld [vmem:[%s7519_s1 + $0xbe4] ss:$16 sps:$4 sm:$0xff]  }
 0x169   :  { %v5484_v21 = vld [vmem:[%s7519_s1 + $0xbec] ss:$16 sps:$4 sm:$0xff]   ;;  %v5479_v40 = vld [vmem:[%s7519_s1 + $0xbe0] ss:$16 sps:$4 sm:$0xff]   ;;  %v5482_v27 = vld [vmem:[%s7519_s1 + $0xbe8] ss:$16 sps:$4 sm:$0xff]  }
 0x16a   :  { %v5487_v41 = vld [vmem:[%s7519_s1 + $0xc04] ss:$16 sps:$4 sm:$0xff]   ;;  %v5490_v43 = vld [vmem:[%s7519_s1 + $0xc0c] ss:$16 sps:$4 sm:$0xff]   ;;  %v5485_v45 = vld [vmem:[%s7519_s1 + $0xc00] ss:$16 sps:$4 sm:$0xff]  }
 0x16b   :  { %3460 = vmatpush1.bf16.msra.mxu0 %v5449_v17  ;;  %3788 = vmatpush1.bf16.msra.mxu1 %v5452_v18  ;;  %v5488_v46 = vld [vmem:[%s7519_s1 + $0xc08] ss:$16 sps:$4 sm:$0xff]   ;;  %v5493_v47 = vld [vmem:[%s7519_s1 + $0xc24] ss:$16 sps:$4 sm:$0xff]   ;;  %v5496_v37 = vld [vmem:[%s7519_s1 + $0xc2c] ss:$16 sps:$4 sm:$0xff]  }
 0x16c   :  { %3461 = vmatprep.subr.bf16.mxu0 %v5457_v19  ;;  %3789 = vmatprep.subr.bf16.mxu1 %v5460_v20  ;;  %v5491_v50 = vld [vmem:[%s7519_s1 + $0xc20] ss:$16 sps:$4 sm:$0xff]   ;;  %v5494_v51 = vld [vmem:[%s7519_s1 + $0xc28] ss:$16 sps:$4 sm:$0xff]   ;;  %v5499_v53 = vld [vmem:[%s7519_s1 + $0xc44] ss:$16 sps:$4 sm:$0xff]  }
 0x16d   :  { %v5502_v54 = vld [vmem:[%s7519_s1 + $0xc4c] ss:$16 sps:$4 sm:$0xff]   ;;  %v5497_v55 = vld [vmem:[%s7519_s1 + $0xc40] ss:$16 sps:$4 sm:$0xff]   ;;  %v5500_v56 = vld [vmem:[%s7519_s1 + $0xc48] ss:$16 sps:$4 sm:$0xff]  }
 0x16e   :  { %v5505_v57 = vld [vmem:[%s7519_s1 + $0xc64] ss:$16 sps:$4 sm:$0xff]   ;;  %v5508_v58 = vld [vmem:[%s7519_s1 + $0xc6c] ss:$16 sps:$4 sm:$0xff]   ;;  %v5503_v59 = vld [vmem:[%s7519_s1 + $0xc60] ss:$16 sps:$4 sm:$0xff]  }
 0x16f   :  { %3462 = vmatpush1.bf16.msra.mxu0 %v5455_v22  ;;  %3790 = vmatpush1.bf16.msra.mxu1 %v5458_v23  ;;  %v5506_v60 = vld [vmem:[%s7519_s1 + $0xc68] ss:$16 sps:$4 sm:$0xff]   ;;  %v5511_v61 = vld [vmem:[%s7519_s1 + $0xc84] ss:$16 sps:$4 sm:$0xff]   ;;  %v5514_v62 = vld [vmem:[%s7519_s1 + $0xc8c] ss:$16 sps:$4 sm:$0xff]  }
 0x170   :  { %3463 = vmatprep.subr.bf16.mxu0 %v5463_v24  ;;  %3791 = vmatprep.subr.bf16.mxu1 %v5466_v13  ;;  %v5509_v63 = vld [vmem:[%s7519_s1 + $0xc80] ss:$16 sps:$4 sm:$0xff]   ;;  %v5512_v0 = vld [vmem:[%s7519_s1 + $0xc88] ss:$16 sps:$4 sm:$0xff]   ;;  %v5517_v1 = vld [vmem:[%s7519_s1 + $0xca4] ss:$16 sps:$4 sm:$0xff]  }
 0x171   :  { %v5520_v2 = vld [vmem:[%s7519_s1 + $0xcac] ss:$16 sps:$4 sm:$0xff]   ;;  %v5515_v3 = vld [vmem:[%s7519_s1 + $0xca0] ss:$16 sps:$4 sm:$0xff]   ;;  %v5518_v4 = vld [vmem:[%s7519_s1 + $0xca8] ss:$16 sps:$4 sm:$0xff]  }
 0x172   :  { %v5523_v5 = vld [vmem:[%s7519_s1 + $0xcc4] ss:$16 sps:$4 sm:$0xff]   ;;  %v5526_v6 = vld [vmem:[%s7519_s1 + $0xccc] ss:$16 sps:$4 sm:$0xff]   ;;  %v5521_v7 = vld [vmem:[%s7519_s1 + $0xcc0] ss:$16 sps:$4 sm:$0xff]  }
 0x173   :  { %3464 = vmatpush1.bf16.msra.mxu0 %v5461_v28  ;;  %3792 = vmatpush1.bf16.msra.mxu1 %v5464_v29  ;;  %v5524_v8 = vld [vmem:[%s7519_s1 + $0xcc8] ss:$16 sps:$4 sm:$0xff]   ;;  %v5529_v9 = vld [vmem:[%s7519_s1 + $0xce4] ss:$16 sps:$4 sm:$0xff]   ;;  %v5532_v10 = vld [vmem:[%s7519_s1 + $0xcec] ss:$16 sps:$4 sm:$0xff]  }
 0x174   :  { %3465 = vmatprep.subr.bf16.mxu0 %v5469_v14  ;;  %3793 = vmatprep.subr.bf16.mxu1 %v5472_v30  ;;  %v5527_v11 = vld [vmem:[%s7519_s1 + $0xce0] ss:$16 sps:$4 sm:$0xff]   ;;  %v5530_v12 = vld [vmem:[%s7519_s1 + $0xce8] ss:$16 sps:$4 sm:$0xff]   ;;  %v5535_v52 = vld [vmem:[%s7519_s1 + $0xd04] ss:$16 sps:$4 sm:$0xff]  }
 0x175   :  { %v5538_v15 = vld [vmem:[%s7519_s1 + $0xd0c] ss:$16 sps:$4 sm:$0xff]   ;;  %v5533_v16 = vld [vmem:[%s7519_s1 + $0xd00] ss:$16 sps:$4 sm:$0xff]   ;;  %v5536_v17 = vld [vmem:[%s7519_s1 + $0xd08] ss:$16 sps:$4 sm:$0xff]  }
 0x176   :  { %v5541_v18 = vld [vmem:[%s7519_s1 + $0xd24] ss:$16 sps:$4 sm:$0xff]   ;;  %v5544_v19 = vld [vmem:[%s7519_s1 + $0xd2c] ss:$16 sps:$4 sm:$0xff]   ;;  %v5539_v20 = vld [vmem:[%s7519_s1 + $0xd20] ss:$16 sps:$4 sm:$0xff]  }
 0x177   :  { %3466 = vmatpush1.bf16.msra.mxu0 %v5467_v31  ;;  %3794 = vmatpush1.bf16.msra.mxu1 %v5470_v25  ;;  %v5542_v22 = vld [vmem:[%s7519_s1 + $0xd28] ss:$16 sps:$4 sm:$0xff]   ;;  %v5547_v23 = vld [vmem:[%s7519_s1 + $0xd44] ss:$16 sps:$4 sm:$0xff]   ;;  %v5550_v24 = vld [vmem:[%s7519_s1 + $0xd4c] ss:$16 sps:$4 sm:$0xff]  }
 0x178   :  { %3467 = vmatprep.subr.bf16.mxu0 %v5475_v32  ;;  %3795 = vmatprep.subr.bf16.mxu1 %v5478_v33  ;;  %v5545_v13 = vld [vmem:[%s7519_s1 + $0xd40] ss:$16 sps:$4 sm:$0xff]   ;;  %v5548_v28 = vld [vmem:[%s7519_s1 + $0xd48] ss:$16 sps:$4 sm:$0xff]   ;;  %v5553_v29 = vld [vmem:[%s7519_s1 + $0xd64] ss:$16 sps:$4 sm:$0xff]  }
 0x179   :  { %v5556_v14 = vld [vmem:[%s7519_s1 + $0xd6c] ss:$16 sps:$4 sm:$0xff]   ;;  %v5551_v30 = vld [vmem:[%s7519_s1 + $0xd60] ss:$16 sps:$4 sm:$0xff]   ;;  %v5554_v31 = vld [vmem:[%s7519_s1 + $0xd68] ss:$16 sps:$4 sm:$0xff]  }
 0x17a   :  { %v5559_v25 = vld [vmem:[%s7519_s1 + $0xd84] ss:$16 sps:$4 sm:$0xff]   ;;  %v5562_v32 = vld [vmem:[%s7519_s1 + $0xd8c] ss:$16 sps:$4 sm:$0xff]   ;;  %v5557_v33 = vld [vmem:[%s7519_s1 + $0xd80] ss:$16 sps:$4 sm:$0xff]  }
 0x17b   :  { %3468 = vmatpush1.bf16.msra.mxu0 %v5473_v26  ;;  %3796 = vmatpush1.bf16.msra.mxu1 %v5476_v36  ;;  %v5560_v34 = vld [vmem:[%s7519_s1 + $0xd88] ss:$16 sps:$4 sm:$0xff]   ;;  %v5565_v26 = vld [vmem:[%s7519_s1 + $0xda4] ss:$16 sps:$4 sm:$0xff]   ;;  %v5568_v36 = vld [vmem:[%s7519_s1 + $0xdac] ss:$16 sps:$4 sm:$0xff]  }
 0x17c   :  { %3469 = vmatprep.subr.bf16.mxu0 %v5481_v38  ;;  %3797 = vmatprep.subr.bf16.mxu1 %v5484_v21  ;;  %v5563_v38 = vld [vmem:[%s7519_s1 + $0xda0] ss:$16 sps:$4 sm:$0xff]   ;;  %v5566_v21 = vld [vmem:[%s7519_s1 + $0xda8] ss:$16 sps:$4 sm:$0xff]   ;;  %v5577_v44 = vld [vmem:[%s7519_s1 + $0xde4] ss:$16 sps:$4 sm:$0xff]  }
 0x17d   :  { %s5743_s11 = smov [#allocation2]   ;;  %vm4241_vm0 = vcmask 74752  }
 0x17e   :  { %s4249_s12 = sshll.u32 %s5743_s11, 4  ;;  %s4250_s12 = int_to_ptr.vmem [resolvable:$true] %s4249_s12 }
 0x17f   :  { %3470 = vmatpush1.bf16.msra.mxu0 %v5479_v40  ;;  %3798 = vmatpush1.bf16.msra.mxu1 %v5482_v27  ;;  %v5571_v40 = vld [vmem:[%s7519_s1 + $0xdc4] ss:$16 sps:$4 sm:$0xff]   ;;  %v5574_v27 = vld [vmem:[%s7519_s1 + $0xdcc] ss:$16 sps:$4 sm:$0xff]   ;;  %s5718_s13 = scalar_lea.vmem %s4250_s12, 32  ;;  %p5723_p1 = scmp.lt.s32.totalorder %s4250_s12, %s4250_s12 }
 0x180   :  { %3480 = vmatprep.subr.bf16.mxu0 %v5487_v41  ;;  %3808 = vmatprep.subr.bf16.mxu1 %v5490_v43  ;;  %v5569_v41 = vld [vmem:[%s7519_s1 + $0xdc0] ss:$16 sps:$4 sm:$0xff]   ;;  %v5572_v43 = vld [vmem:[%s7519_s1 + $0xdc8] ss:$16 sps:$4 sm:$0xff]   ;;  %p5719_p0 = scmp.ne.s32.totalorder %s4250_s12, %s5718_s13  ;;  %p5724_p2 = scmp.lt.s32.totalorder %s5718_s13, %s5718_s13 }
 0x182   :  { %3472 = vmatmul.mubr.bf16.vlgmr.msra.gmra.mrb[0].mxu0 %v654_v35  ;;  %3800 = vmatmul.mubr.bf16.vlgmr.msra.gmra.mrb[0].mxu1 %v654_v35  ;;  %v5580_v35 = vld [vmem:[%s7519_s1 + $0xdec] ss:$16 sps:$4 sm:$0xff]   ;;  %p5725_p3 = por %p5724_p2, %p5723_p1 }
 0x183   :  { %3481 = vmatpush1.bf16.msra.mxu0 %v5485_v45  ;;  %3809 = vmatpush1.bf16.msra.mxu1 %v5488_v46  ;;  %v5575_v45 = vld [vmem:[%s7519_s1 + $0xde0] ss:$16 sps:$4 sm:$0xff]   ;;  %v5578_v46 = vld [vmem:[%s7519_s1 + $0xde8] ss:$16 sps:$4 sm:$0xff]  }
 0x184   :  { %3482 = vmatprep.subr.bf16.mxu0 %v5493_v47  ;;  %3810 = vmatprep.subr.bf16.mxu1 %v5496_v37  ;;  %v5584_v47 = vld [vmem:[%s7519_s1 + $0xe04] ss:$16 sps:$4 sm:$0xff]   ;;  %v5587_v37 = vld [vmem:[%s7519_s1 + $0xe0c] ss:$16 sps:$4 sm:$0xff]   ;;  %p5726_p4 = pnand %p5725_p3, %p5719_p0 }
 0x185   :  { %3512 = vmatprep.mubr.bf16.mxu0 %v7020_v48  ;;  %3840 = vmatprep.mubr.bf16.mxu1 %v7020_v48 }
 0x187   :  { %3483 = vmatpush1.bf16.msra.mxu0 %v5491_v50  ;;  %3811 = vmatpush1.bf16.msra.mxu1 %v5494_v51  ;;  %v7206_v50 = vrot.slane %v6989_v39, %v5909_v49  ;;  %v5582_v51 = vld [vmem:[%s7519_s1 + $0xe00] ss:$16 sps:$4 sm:$0xff]   ;;  %v5593_v49 = vld [vmem:[%s7519_s1 + $0xe2c] ss:$16 sps:$4 sm:$0xff]   ;;  %v657_v39 = vcombine.high %v7020_v48, %v7020_v48  ;;  %v5596_v48 = vld [vmem:[%s7519_s1 + $0xe44] ss:$16 sps:$4 sm:$0xff]  }
 0x188   :  { %3484 = vmatprep.subr.bf16.mxu0 %v5499_v53  ;;  %3812 = vmatprep.subr.bf16.mxu1 %v5502_v54  ;;  %v5585_v53 = vld [vmem:[%s7519_s1 + $0xe08] ss:$16 sps:$4 sm:$0xff]   ;;  %v5590_v54 = vld [vmem:[%s7519_s1 + $0xe24] ss:$16 sps:$4 sm:$0xff]  }
 0x18b   :  { %3485 = vmatpush1.bf16.msra.mxu0 %v5497_v55  ;;  %3813 = vmatpush1.bf16.msra.mxu1 %v5500_v56  ;;  %v5588_v55 = vld [vmem:[%s7519_s1 + $0xe20] ss:$16 sps:$4 sm:$0xff]   ;;  %v5591_v56 = vld [vmem:[%s7519_s1 + $0xe28] ss:$16 sps:$4 sm:$0xff]  }
 0x18c   :  { %3486 = vmatprep.subr.bf16.mxu0 %v5505_v57  ;;  %3814 = vmatprep.subr.bf16.mxu1 %v5508_v58  ;;  %v5599_v57 = vld [vmem:[%s7519_s1 + $0xe4c] ss:$16 sps:$4 sm:$0xff]   ;;  %v5594_v58 = vld [vmem:[%s7519_s1 + $0xe40] ss:$16 sps:$4 sm:$0xff]  }
 0x18f   :  { %3487 = vmatpush1.bf16.msra.mxu0 %v5503_v59  ;;  %3815 = vmatpush1.bf16.msra.mxu1 %v5506_v60  ;;  %v5597_v59 = vld [vmem:[%s7519_s1 + $0xe48] ss:$16 sps:$4 sm:$0xff]   ;;  %v5602_v60 = vld [vmem:[%s7519_s1 + $0xe64] ss:$16 sps:$4 sm:$0xff]  }
 0x190   :  { %3488 = vmatprep.subr.bf16.mxu0 %v5511_v61  ;;  %3816 = vmatprep.subr.bf16.mxu1 %v5514_v62  ;;  %v5605_v61 = vld [vmem:[%s7519_s1 + $0xe6c] ss:$16 sps:$4 sm:$0xff]   ;;  %v5600_v62 = vld [vmem:[%s7519_s1 + $0xe60] ss:$16 sps:$4 sm:$0xff]  }
 0x193   :  { %3489 = vmatpush1.bf16.msra.mxu0 %v5509_v63  ;;  %3817 = vmatpush1.bf16.msra.mxu1 %v5512_v0  ;;  %v5603_v63 = vld [vmem:[%s7519_s1 + $0xe68] ss:$16 sps:$4 sm:$0xff]   ;;  %v5608_v0 = vld [vmem:[%s7519_s1 + $0xe84] ss:$16 sps:$4 sm:$0xff]  }
 0x194   :  { %3490 = vmatprep.subr.bf16.mxu0 %v5517_v1  ;;  %3818 = vmatprep.subr.bf16.mxu1 %v5520_v2  ;;  %v5611_v1 = vld [vmem:[%s7519_s1 + $0xe8c] ss:$16 sps:$4 sm:$0xff]   ;;  %v5606_v2 = vld [vmem:[%s7519_s1 + $0xe80] ss:$16 sps:$4 sm:$0xff]  }
 0x197   :  { %3491 = vmatpush1.bf16.msra.mxu0 %v5515_v3  ;;  %3819 = vmatpush1.bf16.msra.mxu1 %v5518_v4  ;;  %v5609_v3 = vld [vmem:[%s7519_s1 + $0xe88] ss:$16 sps:$4 sm:$0xff]   ;;  %v5614_v4 = vld [vmem:[%s7519_s1 + $0xea4] ss:$16 sps:$4 sm:$0xff]  }
 0x198   :  { %3492 = vmatprep.subr.bf16.mxu0 %v5523_v5  ;;  %3820 = vmatprep.subr.bf16.mxu1 %v5526_v6  ;;  %v5617_v5 = vld [vmem:[%s7519_s1 + $0xeac] ss:$16 sps:$4 sm:$0xff]   ;;  %v5612_v6 = vld [vmem:[%s7519_s1 + $0xea0] ss:$16 sps:$4 sm:$0xff]  }
 0x19b   :  { %3493 = vmatpush1.bf16.msra.mxu0 %v5521_v7  ;;  %3821 = vmatpush1.bf16.msra.mxu1 %v5524_v8  ;;  %v5615_v7 = vld [vmem:[%s7519_s1 + $0xea8] ss:$16 sps:$4 sm:$0xff]   ;;  %v5620_v8 = vld [vmem:[%s7519_s1 + $0xec4] ss:$16 sps:$4 sm:$0xff]  }
 0x19c   :  { %3494 = vmatprep.subr.bf16.mxu0 %v5529_v9  ;;  %3822 = vmatprep.subr.bf16.mxu1 %v5532_v10  ;;  %v5623_v9 = vld [vmem:[%s7519_s1 + $0xecc] ss:$16 sps:$4 sm:$0xff]   ;;  %v5618_v10 = vld [vmem:[%s7519_s1 + $0xec0] ss:$16 sps:$4 sm:$0xff]  }
 0x19f   :  { %3495 = vmatpush1.bf16.msra.mxu0 %v5527_v11  ;;  %3823 = vmatpush1.bf16.msra.mxu1 %v5530_v12  ;;  %v5621_v11 = vld [vmem:[%s7519_s1 + $0xec8] ss:$16 sps:$4 sm:$0xff]   ;;  %v5626_v12 = vld [vmem:[%s7519_s1 + $0xee4] ss:$16 sps:$4 sm:$0xff]  }
 0x1a0   :  { %3496 = vmatprep.subr.bf16.mxu0 %v5535_v52  ;;  %3824 = vmatprep.subr.bf16.mxu1 %v5538_v15  ;;  %v5629_v52 = vld [vmem:[%s7519_s1 + $0xeec] ss:$16 sps:$4 sm:$0xff]   ;;  %v5624_v15 = vld [vmem:[%s7519_s1 + $0xee0] ss:$16 sps:$4 sm:$0xff]  }
 0x1a3   :  { %3497 = vmatpush1.bf16.msra.mxu0 %v5533_v16  ;;  %3825 = vmatpush1.bf16.msra.mxu1 %v5536_v17  ;;  %v5627_v16 = vld [vmem:[%s7519_s1 + $0xee8] ss:$16 sps:$4 sm:$0xff]   ;;  %v5632_v17 = vld [vmem:[%s7519_s1 + $0xf04] ss:$16 sps:$4 sm:$0xff]  }
 0x1a4   :  { %3498 = vmatprep.subr.bf16.mxu0 %v5541_v18  ;;  %3826 = vmatprep.subr.bf16.mxu1 %v5544_v19  ;;  %v5635_v18 = vld [vmem:[%s7519_s1 + $0xf0c] ss:$16 sps:$4 sm:$0xff]   ;;  %v5630_v19 = vld [vmem:[%s7519_s1 + $0xf00] ss:$16 sps:$4 sm:$0xff]  }
 0x1a7   :  { %3499 = vmatpush1.bf16.msra.mxu0 %v5539_v20  ;;  %3827 = vmatpush1.bf16.msra.mxu1 %v5542_v22  ;;  %v5633_v20 = vld [vmem:[%s7519_s1 + $0xf08] ss:$16 sps:$4 sm:$0xff]   ;;  %v5638_v22 = vld [vmem:[%s7519_s1 + $0xf24] ss:$16 sps:$4 sm:$0xff]  }
 0x1a8   :  { %3500 = vmatprep.subr.bf16.mxu0 %v5547_v23  ;;  %3828 = vmatprep.subr.bf16.mxu1 %v5550_v24  ;;  %v5641_v23 = vld [vmem:[%s7519_s1 + $0xf2c] ss:$16 sps:$4 sm:$0xff]   ;;  %v5636_v24 = vld [vmem:[%s7519_s1 + $0xf20] ss:$16 sps:$4 sm:$0xff]  }
 0x1ab   :  { %3501 = vmatpush1.bf16.msra.mxu0 %v5545_v13  ;;  %3829 = vmatpush1.bf16.msra.mxu1 %v5548_v28  ;;  %v5639_v13 = vld [vmem:[%s7519_s1 + $0xf28] ss:$16 sps:$4 sm:$0xff]   ;;  %v5644_v28 = vld [vmem:[%s7519_s1 + $0xf44] ss:$16 sps:$4 sm:$0xff]  }
 0x1ac   :  { %3502 = vmatprep.subr.bf16.mxu0 %v5553_v29  ;;  %3830 = vmatprep.subr.bf16.mxu1 %v5556_v14  ;;  %v5647_v29 = vld [vmem:[%s7519_s1 + $0xf4c] ss:$16 sps:$4 sm:$0xff]   ;;  %v5642_v14 = vld [vmem:[%s7519_s1 + $0xf40] ss:$16 sps:$4 sm:$0xff]  }
 0x1af   :  { %3503 = vmatpush1.bf16.msra.mxu0 %v5551_v30  ;;  %3831 = vmatpush1.bf16.msra.mxu1 %v5554_v31  ;;  %v5645_v30 = vld [vmem:[%s7519_s1 + $0xf48] ss:$16 sps:$4 sm:$0xff]   ;;  %v5650_v31 = vld [vmem:[%s7519_s1 + $0xf64] ss:$16 sps:$4 sm:$0xff]  }
 0x1b0   :  { %3504 = vmatprep.subr.bf16.mxu0 %v5559_v25  ;;  %3832 = vmatprep.subr.bf16.mxu1 %v5562_v32  ;;  %v5653_v25 = vld [vmem:[%s7519_s1 + $0xf6c] ss:$16 sps:$4 sm:$0xff]   ;;  %v5648_v32 = vld [vmem:[%s7519_s1 + $0xf60] ss:$16 sps:$4 sm:$0xff]  }
 0x1b3   :  { %3505 = vmatpush1.bf16.msra.mxu0 %v5557_v33  ;;  %3833 = vmatpush1.bf16.msra.mxu1 %v5560_v34  ;;  %v5651_v33 = vld [vmem:[%s7519_s1 + $0xf68] ss:$16 sps:$4 sm:$0xff]   ;;  %v5656_v34 = vld [vmem:[%s7519_s1 + $0xf84] ss:$16 sps:$4 sm:$0xff]  }
 0x1b4   :  { %3506 = vmatprep.subr.bf16.mxu0 %v5565_v26  ;;  %3834 = vmatprep.subr.bf16.mxu1 %v5568_v36  ;;  %v5659_v26 = vld [vmem:[%s7519_s1 + $0xf8c] ss:$16 sps:$4 sm:$0xff]   ;;  %v5654_v36 = vld [vmem:[%s7519_s1 + $0xf80] ss:$16 sps:$4 sm:$0xff]  }
 0x1b7   :  { %3507 = vmatpush1.bf16.msra.mxu0 %v5563_v38  ;;  %3835 = vmatpush1.bf16.msra.mxu1 %v5566_v21  ;;  %v5657_v38 = vld [vmem:[%s7519_s1 + $0xf88] ss:$16 sps:$4 sm:$0xff]   ;;  %v5662_v21 = vld [vmem:[%s7519_s1 + $0xfa4] ss:$16 sps:$4 sm:$0xff]  }
 0x1b8   :  { %3508 = vmatprep.subr.bf16.mxu0 %v5571_v40  ;;  %3836 = vmatprep.subr.bf16.mxu1 %v5574_v27  ;;  %v5665_v40 = vld [vmem:[%s7519_s1 + $0xfac] ss:$16 sps:$4 sm:$0xff]   ;;  %v5660_v27 = vld [vmem:[%s7519_s1 + $0xfa0] ss:$16 sps:$4 sm:$0xff]  }
 0x1bb   :  { %3509 = vmatpush1.bf16.msra.mxu0 %v5569_v41  ;;  %3837 = vmatpush1.bf16.msra.mxu1 %v5572_v43  ;;  %v5663_v41 = vld [vmem:[%s7519_s1 + $0xfa8] ss:$16 sps:$4 sm:$0xff]   ;;  %v5668_v43 = vld [vmem:[%s7519_s1 + $0xfc4] ss:$16 sps:$4 sm:$0xff]  }
 0x1bc   :  { %3510 = vmatprep.subr.bf16.mxu0 %v5577_v44  ;;  %3838 = vmatprep.subr.bf16.mxu1 %v5580_v35  ;;  %v5671_v44 = vld [vmem:[%s7519_s1 + $0xfcc] ss:$16 sps:$4 sm:$0xff]   ;;  %v5666_v35 = vld [vmem:[%s7519_s1 + $0xfc0] ss:$16 sps:$4 sm:$0xff]  }
 0x1bf   :  { %3511 = vmatpush1.bf16.msra.mxu0 %v5575_v45  ;;  %3839 = vmatpush1.bf16.msra.mxu1 %v5578_v46  ;;  %v5669_v45 = vld [vmem:[%s7519_s1 + $0xfc8] ss:$16 sps:$4 sm:$0xff]   ;;  %v5674_v46 = vld [vmem:[%s7519_s1 + $0xfe4] ss:$16 sps:$4 sm:$0xff]  }
 0x1c0   :  { %3521 = vmatprep.subr.bf16.mxu0 %v5584_v47  ;;  %3849 = vmatprep.subr.bf16.mxu1 %v5587_v37  ;;  %v5677_v47 = vld [vmem:[%s7519_s1 + $0xfec] ss:$16 sps:$4 sm:$0xff]   ;;  %v5672_v37 = vld [vmem:[%s7519_s1 + $0xfe0] ss:$16 sps:$4 sm:$0xff]  }
 0x1c2   :  { %3513 = vmatmul.mubr.bf16.vlgmr.msra.gmra.mrb[0].mxu0 %v7206_v50  ;;  %3841 = vmatmul.mubr.bf16.vlgmr.msra.gmra.mrb[0].mxu1 %v7206_v50 }
 0x1c3   :  { %3522 = vmatpush1.bf16.msra.mxu0 %v5582_v51  ;;  %3850 = vmatpush1.bf16.msra.mxu1 %v5585_v53  ;;  %v5675_v51 = vld [vmem:[%s7519_s1 + $0xfe8] ss:$16 sps:$4 sm:$0xff]   ;;  %v5678_v53 = vld [vmem:[%s7521_s3 + $0x40] sm:$0xff]  }
 0x1c4   :  { %3523 = vmatprep.subr.bf16.mxu0 %v5590_v54  ;;  %3851 = vmatprep.subr.bf16.mxu1 %v5593_v49  ;;  %v5679_v54 = vld [vmem:[%s7521_s3 + $0xc0] sm:$0xff]   ;;  %v655_v49 = vcombine.high %v7206_v50, %v7206_v50  ;;  %v5683_v50 = vld [vmem:[%s7521_s3 + $0xc8] sm:$0xff]  }
 0x1c5   :  { %3553 = vmatprep.mubr.bf16.mxu0 %v657_v39  ;;  %3881 = vmatprep.mubr.bf16.mxu1 %v657_v39  ;;  %v5680_v39 = vld [vmem:[%s7521_s3] sm:$0xff]  }
 0x1c7   :  { %3524 = vmatpush1.bf16.msra.mxu0 %v5588_v55  ;;  %3852 = vmatpush1.bf16.msra.mxu1 %v5591_v56  ;;  %v5681_v55 = vld [vmem:[%s7521_s3 + $0x80] sm:$0xff]   ;;  %v5682_v56 = vld [vmem:[%s7521_s3 + $0x48] sm:$0xff]  }
 0x1c8   :  { %3525 = vmatprep.subr.bf16.mxu0 %v5596_v48  ;;  %3853 = vmatprep.subr.bf16.mxu1 %v5599_v57  ;;  %v5684_v48 = vld [vmem:[%s7521_s3 + $0x8] sm:$0xff]  }
 0x1c9   :  { %v5685_v57 = vld [vmem:[%s7521_s3 + $0x88] sm:$0xff]  }
 0x1cb   :  { %3526 = vmatpush1.bf16.msra.mxu0 %v5594_v58  ;;  %3854 = vmatpush1.bf16.msra.mxu1 %v5597_v59  ;;  %v5686_v58 = vld [vmem:[%s7521_s3 + $0x50] sm:$0xff]  }
 0x1cc   :  { %3527 = vmatprep.subr.bf16.mxu0 %v5602_v60  ;;  %3855 = vmatprep.subr.bf16.mxu1 %v5605_v61  ;;  %v5687_v59 = vld [vmem:[%s7521_s3 + $0xd0] sm:$0xff]  }
 0x1cd   :  { %v5688_v60 = vld [vmem:[%s7521_s3 + $0x10] sm:$0xff]  }
 0x1ce   :  { %v5689_v61 = vld [vmem:[%s7521_s3 + $0x90] sm:$0xff]  }
 0x1cf   :  { %3528 = vmatpush1.bf16.msra.mxu0 %v5600_v62  ;;  %3856 = vmatpush1.bf16.msra.mxu1 %v5603_v63  ;;  %v5690_v62 = vld [vmem:[%s7521_s3 + $0x58] sm:$0xff]  }
 0x1d0   :  { %3529 = vmatprep.subr.bf16.mxu0 %v5608_v0  ;;  %3857 = vmatprep.subr.bf16.mxu1 %v5611_v1  ;;  %v5691_v63 = vld [vmem:[%s7521_s3 + $0xd8] sm:$0xff]  }
 0x1d1   :  { %v5692_v0 = vld [vmem:[%s7521_s3 + $0x18] sm:$0xff]  }
 0x1d2   :  { %v5693_v1 = vld [vmem:[%s7521_s3 + $0x98] sm:$0xff]  }
 0x1d3   :  { %3530 = vmatpush1.bf16.msra.mxu0 %v5606_v2  ;;  %3858 = vmatpush1.bf16.msra.mxu1 %v5609_v3  ;;  %v5694_v2 = vld [vmem:[%s7521_s3 + $0x60] sm:$0xff]  }
 0x1d4   :  { %3531 = vmatprep.subr.bf16.mxu0 %v5614_v4  ;;  %3859 = vmatprep.subr.bf16.mxu1 %v5617_v5  ;;  %v5695_v3 = vld [vmem:[%s7521_s3 + $0xe0] sm:$0xff]  }
 0x1d5   :  { %v5696_v4 = vld [vmem:[%s7521_s3 + $0x20] sm:$0xff]  }
 0x1d6   :  { %v5697_v5 = vld [vmem:[%s7521_s3 + $0xa0] sm:$0xff]  }
 0x1d7   :  { %3532 = vmatpush1.bf16.msra.mxu0 %v5612_v6  ;;  %3860 = vmatpush1.bf16.msra.mxu1 %v5615_v7  ;;  %v5698_v6 = vld [vmem:[%s7521_s3 + $0x68] sm:$0xff]  }
 0x1d8   :  { %3533 = vmatprep.subr.bf16.mxu0 %v5620_v8  ;;  %3861 = vmatprep.subr.bf16.mxu1 %v5623_v9  ;;  %v5699_v7 = vld [vmem:[%s7521_s3 + $0xe8] sm:$0xff]  }
 0x1d9   :  { %v5700_v8 = vld [vmem:[%s7521_s3 + $0x28] sm:$0xff]  }
 0x1da   :  { %v5701_v9 = vld [vmem:[%s7521_s3 + $0xa8] sm:$0xff]  }
 0x1db   :  { %3534 = vmatpush1.bf16.msra.mxu0 %v5618_v10  ;;  %3862 = vmatpush1.bf16.msra.mxu1 %v5621_v11  ;;  %v5702_v10 = vld [vmem:[%s7521_s3 + $0x70] sm:$0xff]  }
 0x1dc   :  { %3535 = vmatprep.subr.bf16.mxu0 %v5626_v12  ;;  %3863 = vmatprep.subr.bf16.mxu1 %v5629_v52  ;;  %v5703_v11 = vld [vmem:[%s7521_s3 + $0xf0] sm:$0xff]  }
 0x1dd   :  { %v5704_v12 = vld [vmem:[%s7521_s3 + $0x30] sm:$0xff]  }
 0x1de   :  { %v5705_v52 = vld [vmem:[%s7521_s3 + $0xb0] sm:$0xff]  }
 0x1df   :  { %3536 = vmatpush1.bf16.msra.mxu0 %v5624_v15  ;;  %3864 = vmatpush1.bf16.msra.mxu1 %v5627_v16  ;;  %v5706_v15 = vld [vmem:[%s7521_s3 + $0x78] sm:$0xff]  }
 0x1e0   :  { %3537 = vmatprep.subr.bf16.mxu0 %v5632_v17  ;;  %3865 = vmatprep.subr.bf16.mxu1 %v5635_v18  ;;  %v5707_v16 = vld [vmem:[%s7521_s3 + $0xf8] sm:$0xff]  }
 0x1e1   :  { %v5708_v17 = vld [vmem:[%s7521_s3 + $0x38] sm:$0xff]  }
 0x1e2   :  { %v5709_v18 = vld [vmem:[%s7521_s3 + $0xb8] sm:$0xff]  }
 0x1e3   :  { %3538 = vmatpush1.bf16.msra.mxu0 %v5630_v19  ;;  %3866 = vmatpush1.bf16.msra.mxu1 %v5633_v20  ;;  %v540_v19 = vsub.s32 0, %v5891_v42  ;;  %v548_v20 = vsub.s32 2, %v5891_v42 }
 0x1e4   :  { %3539 = vmatprep.subr.bf16.mxu0 %v5638_v22  ;;  %3867 = vmatprep.subr.bf16.mxu1 %v5641_v23  ;;  %v536_v22 = vld [vmem:[%s7520_s2] sm:$0xf]  ;;  %v544_v23 = vsub.s32 1, %v5891_v42 }
 0x1e7   :  { %3540 = vmatpush1.bf16.msra.mxu0 %v5636_v24  ;;  %3868 = vmatpush1.bf16.msra.mxu1 %v5639_v13  ;;  %v552_v24 = vsub.s32 3, %v5891_v42  ;;  %v541_v13 = vrot.slane %v536_v22, %v540_v19 }
 0x1e8   :  { %3541 = vmatprep.subr.bf16.mxu0 %v5644_v28  ;;  %3869 = vmatprep.subr.bf16.mxu1 %v5647_v29  ;;  %v549_v28 = vrot.slane %v536_v22, %v548_v20  ;;  %v545_v29 = vrot.slane %v536_v22, %v544_v23 }
 0x1eb   :  { %3542 = vmatpush1.bf16.msra.mxu0 %v5642_v14  ;;  %3870 = vmatpush1.bf16.msra.mxu1 %v5645_v30  ;;  %v553_v14 = vrot.slane %v536_v22, %v552_v24 }
 0x1ec   :  { %3543 = vmatprep.subr.bf16.mxu0 %v5650_v31  ;;  %3871 = vmatprep.subr.bf16.mxu1 %v5653_v25 }
 0x1ef   :  { %3544 = vmatpush1.bf16.msra.mxu0 %v5648_v32  ;;  %3872 = vmatpush1.bf16.msra.mxu1 %v5651_v33 }
 0x1f0   :  { %3545 = vmatprep.subr.bf16.mxu0 %v5656_v34  ;;  %3873 = vmatprep.subr.bf16.mxu1 %v5659_v26 }
 0x1f3   :  { %3546 = vmatpush1.bf16.msra.mxu0 %v5654_v36  ;;  %3874 = vmatpush1.bf16.msra.mxu1 %v5657_v38 }
 0x1f4   :  { %3547 = vmatprep.subr.bf16.mxu0 %v5662_v21  ;;  %3875 = vmatprep.subr.bf16.mxu1 %v5665_v40 }
 0x1f7   :  { %3548 = vmatpush1.bf16.msra.mxu0 %v5660_v27  ;;  %3876 = vmatpush1.bf16.msra.mxu1 %v5663_v41 }
 0x1f8   :  { %3549 = vmatprep.subr.bf16.mxu0 %v5668_v43  ;;  %3877 = vmatprep.subr.bf16.mxu1 %v5671_v44 }
 0x1fb   :  { %3550 = vmatpush1.bf16.msra.mxu0 %v5666_v35  ;;  %3878 = vmatpush1.bf16.msra.mxu1 %v5669_v45 }
 0x1fc   :  { %3551 = vmatprep.subr.bf16.mxu0 %v5674_v46  ;;  %3879 = vmatprep.subr.bf16.mxu1 %v5677_v47 }
 0x1ff   :  { %3552 = vmatpush1.bf16.msra.mxu0 %v5672_v37  ;;  %3880 = vmatpush1.bf16.msra.mxu1 %v5675_v51 }
 0x200   :  { %4802 = vmatprep.subr.bf16.mxu0 %v5678_v53  ;;  %4824 = vmatprep.subr.bf16.mxu1 %v5679_v54  ;;  %v4769_v53 = vld [vmem:[%s7522_s4] ss:$0 sm:$0xff] }
 0x202   :  { %3554 = vmatmul.mubr.bf16.vlgmr.msra.gmra.mrb[0].mxu0 %v655_v49  ;;  %3882 = vmatmul.mubr.bf16.vlgmr.msra.gmra.mrb[0].mxu1 %v655_v49 }
 0x203   :  { %4803 = vmatpush3.bf16.msra.mxu0 %v5680_v39  ;;  %4825 = vmatpush3.bf16.msra.mxu1 %v5681_v55 }
 0x204   :  { %4804 = vmatprep.subr.bf16.mxu0 %v5682_v56  ;;  %4826 = vmatprep.subr.bf16.mxu1 %v5683_v50 }
 0x207   :  { %4805 = vmatpush3.bf16.msra.mxu0 %v5684_v48  ;;  %4827 = vmatpush3.bf16.msra.mxu1 %v5685_v57 }
 0x208   :  { %4806 = vmatprep.subr.bf16.mxu0 %v5686_v58  ;;  %4828 = vmatprep.subr.bf16.mxu1 %v5687_v59 }
 0x20b   :  { %4807 = vmatpush3.bf16.msra.mxu0 %v5688_v60  ;;  %4829 = vmatpush3.bf16.msra.mxu1 %v5689_v61 }
 0x20c   :  { %4808 = vmatprep.subr.bf16.mxu0 %v5690_v62  ;;  %4830 = vmatprep.subr.bf16.mxu1 %v5691_v63 }
 0x20f   :  { %4809 = vmatpush3.bf16.msra.mxu0 %v5692_v0  ;;  %4831 = vmatpush3.bf16.msra.mxu1 %v5693_v1 }
 0x210   :  { %4810 = vmatprep.subr.bf16.mxu0 %v5694_v2  ;;  %4832 = vmatprep.subr.bf16.mxu1 %v5695_v3 }
 0x213   :  { %4811 = vmatpush3.bf16.msra.mxu0 %v5696_v4  ;;  %4833 = vmatpush3.bf16.msra.mxu1 %v5697_v5 }
 0x214   :  { %4812 = vmatprep.subr.bf16.mxu0 %v5698_v6  ;;  %4834 = vmatprep.subr.bf16.mxu1 %v5699_v7 }
 0x217   :  { %4813 = vmatpush3.bf16.msra.mxu0 %v5700_v8  ;;  %4835 = vmatpush3.bf16.msra.mxu1 %v5701_v9 }
 0x218   :  { %4814 = vmatprep.subr.bf16.mxu0 %v5702_v10  ;;  %4836 = vmatprep.subr.bf16.mxu1 %v5703_v11 }
 0x21b   :  { %4815 = vmatpush3.bf16.msra.mxu0 %v5704_v12  ;;  %4837 = vmatpush3.bf16.msra.mxu1 %v5705_v52 }
 0x21c   :  { %4816 = vmatprep.subr.bf16.mxu0 %v5706_v15  ;;  %4838 = vmatprep.subr.bf16.mxu1 %v5707_v16 }
 0x21f   :  { %4817 = vmatpush3.bf16.msra.mxu0 %v5708_v17  ;;  %4839 = vmatpush3.bf16.msra.mxu1 %v5709_v18 }
 0x2d5   :  { %v3555_v30 = vpop.f32.mrb[0].mxu0  ;;  %v3883_v31 = vpop.f32.mrb[0].mxu1 }
 0x2d6   :  { %v4846_v25 = vadd.f32 %v3555_v30, %v541_v13  ;;  %v4848_v32 = vadd.f32 %v3883_v31, %v549_v28  ;;  %v3557_v33 = vpop.f32.mrb[1].mxu0  ;;  %v3885_v34 = vpop.f32.mrb[1].mxu1 }
 0x2d7   :  { %v4847_v26 = vadd.f32 %v3557_v33, %v545_v29  ;;  %v4849_v36 = vadd.f32 %v3885_v34, %v553_v14  ;;  %v3559_v38 = vpop.f32.mrb[2].mxu0  ;;  %v3887_v21 = vpop.f32.mrb[2].mxu1 }
 0x2d8   :  { %5710 = vtanh.f32 %v4846_v25  ;;  %v3560_v40 = vpop.f32.mrb[3].mxu0  ;;  %v3888_v27 = vpop.f32.mrb[3].mxu1 }
 0x2d9   :  { %5712 = vtanh.f32 %v4848_v32 }
 0x2da   :  { %5714 = vtanh.f32 %v4847_v26 }
 0x2db   :  { %5716 = vtanh.f32 %v4849_v36 }
 0x2e2   :  { %v5711_v42 = vpop.eup %5710 }
 0x2e3   :  { %v5713_v41 = vpop.eup %5712  ;;  %v3894_v45 = vpack.c.bf16 %v5711_v42, %v5711_v42 }
 0x2e4   :  { %v5715_v43 = vpop.eup %5714  ;;  %v3896_v47 = vpack.c.bf16 %v5713_v41, %v5713_v41 }
 0x2e5   :  { %v5717_v44 = vpop.eup %5716  ;;  %v3895_v35 = vpack.c.bf16 %v5715_v43, %v5715_v43 }
 0x2e6   :  { %v3897_v46 = vpack.c.bf16 %v5717_v44, %v5717_v44 }
 0x2e7   :  { %4193 = vmatprep.mubr.bf16.mxu0 %v3895_v35 }
 0x2e8   :  { %4233 = vmatprep.mubr.bf16.mxu1 %v3897_v46  ;;  %4194 = vmatmul.mubr.bf16.vlgmr.msra.gmra.mrb[4].mxu0 %v3894_v45 }
 0x2e9   :  { %4234 = vmatmul.mubr.bf16.vlgmr.msra.gmra.mrb[4].mxu1 %v3896_v47 }
 0x3bb   :  { %v4818_v37 = vpop.f32.mrb[4].mxu0 }
 0x3bc   :  { %v4840_v51 = vpop.f32.mrb[4].mxu1  ;;  %v4819_v54 = vpop.f32.mrb[5].mxu0 }
 0x3bd   :  { %v4820_v49 = vadd.f32 %v4819_v54, %v4818_v37  ;;  %v4841_v39 = vpop.f32.mrb[5].mxu1  ;;  %v4821_v55 = vpop.f32.mrb[6].mxu0 }
 0x3be   :  { %v4842_v56 = vadd.f32 %v4841_v39, %v4840_v51  ;;  %v4843_v50 = vpop.f32.mrb[6].mxu1  ;;  %v4822_v48 = vpop.f32.mrb[7].mxu0 }
 0x3bf   :  { %v4196_v57 = vadd.f32 %v4820_v49, %v4769_v53  ;;  %v4844_v58 = vpop.f32.mrb[7].mxu1 }
 0x3c1   :  { %v4236_v59 = vadd.f32 %v4842_v56, %v4196_v57 }
 0x3c3   :  { %4242 = vst.msk [vmem:[#allocation2] sm:$0x3] %vm4241_vm0, %v4236_v59 }
 0x3c4   :  { %5729 = shalt.err (!%p5726_p4)
}
 0x3c5   :  { %s5730_s15 = scalar_lea.hbm %s7523_s5, 32 }
 0x3c6   :  { %p5731_p5 = scmp.ne.s32.totalorder %s7523_s5, %s5730_s15  ;;  %p5734_p6 = scmp.lt.u32.totalorder %s5730_s15, %s7523_s5 }
 0x3c8   :  { %p5736_p7 = pnand %p5734_p6, %p5731_p5 }
 0x3ca   :  { %5739 = shalt.err (!%p5736_p7)
}
 0x3cb   :  { %4252 = dma.vmem_to_hbm [thread:$0]  %s4250_s12, 32, %s7523_s5, [#allocation3]  }
 0x3cc   :  { %5740 = dma.done.wait [#allocation3], 32  }
 0x3cd   :  { %5741 = vsyncadd [#allocation3], 4294967264 }
 0x3ce   :  { %4256 = vsyncpa [#allocation3], 1 }

</bundles_post_ra>
